<compile_context>
chip_gen: v7x
topology: tpu7x:2x2x1
jax: 0.10.0
libtpu: 0.0.40
codegen_flags: <defaults>
</compile_context>

<pallas_src>
import functools

import jax
import jax.numpy as jnp
from jax.experimental import pallas as pl
from jax.experimental.pallas import tpu as pltpu

_LANE = 128


def _round_up(x, m):
    return (x + m - 1) // m * m


def _gcn_agg_kernel(a_ref, y_ref, w_ref, b_ref, o_ref, acc_ref, deg_ref, *,
                    apply_relu):
    """One GraphConv layer: o = act(((A @ Y) * 1/max(deg,1)) @ W + b).

    grid = (dst-row tiles i, source/reduction tiles k); k is the last axis.
    """
    k = pl.program_id(1)

    @pl.when(k == 0)
    def _init():
        acc_ref[...] = jnp.zeros_like(acc_ref)
        deg_ref[...] = jnp.zeros_like(deg_ref)

    a = a_ref[...]                                           # [TM, TK] bf16 (0/1)
    acc_ref[...] += jnp.dot(a, y_ref[...],                   # bf16 MXU, f32 acc
                            preferred_element_type=jnp.float32)
    # In-degree partial sums across K tiles (exact: 0/1 entries summed in f32).
    deg_ref[...] += jnp.sum(a.astype(jnp.float32), axis=1, keepdims=True)

    @pl.when(k == pl.num_programs(1) - 1)
    def _finalize():
        inv_deg = pl.reciprocal(jnp.maximum(deg_ref[...], 1.0), approx=True)
        z = acc_ref[...] * inv_deg                           # [TM, Fy] f32
        out = jnp.dot(z, w_ref[...],
                      preferred_element_type=jnp.float32) + b_ref[...]
        if apply_relu:
            # Dropout(0.5) is identity in eval mode; only ReLU applies.
            out = jnp.maximum(out, 0.0)
        o_ref[...] = out.astype(o_ref.dtype)                 # lane-dense store


def _gcn_layer(adj, y, w, b, *, apply_relu, out_dtype, tm, tk):
    """adj: [Np,Np] bf16, y: [Np,Fy] bf16, w: [Fy,Fo] f32, b: [1,Fo] f32."""
    np_ = adj.shape[0]
    fy = y.shape[1]
    fo = w.shape[1]
    grid = (np_ // tm, np_ // tk)

    kernel = functools.partial(_gcn_agg_kernel, apply_relu=apply_relu)

    out_bytes = np_ * fo * jnp.dtype(out_dtype).itemsize
    cost = pl.CostEstimate(
        flops=2 * np_ * np_ * fy + 2 * np_ * fy * fo,
        transcendentals=np_,  # approx reciprocal per row
        bytes_accessed=(adj.size * adj.dtype.itemsize
                        + y.size * y.dtype.itemsize
                        + w.size * 4 + b.size * 4 + out_bytes),
    )

    return pl.pallas_call(
        kernel,
        out_shape=jax.ShapeDtypeStruct((np_, fo), out_dtype),
        grid_spec=pltpu.PrefetchScalarGridSpec(
            num_scalar_prefetch=0,
            grid=grid,
            in_specs=[
                pl.BlockSpec((tm, tk), lambda i, k: (i, k)),   # A row/col tile
                pl.BlockSpec((tk, fy), lambda i, k: (k, 0)),   # Y source tile
                pl.BlockSpec((fy, fo), lambda i, k: (0, 0)),   # W (whole)
                pl.BlockSpec((1, fo), lambda i, k: (0, 0)),    # bias (whole)
            ],
            out_specs=pl.BlockSpec((tm, fo), lambda i, k: (i, 0)),
            scratch_shapes=[
                pltpu.VMEM((tm, fy), jnp.float32),             # accumulator
                pltpu.VMEM((tm, 1), jnp.float32),              # in-degree
            ],
        ),
        compiler_params=pltpu.CompilerParams(
            dimension_semantics=("parallel", "arbitrary")),
        cost_estimate=cost,
    )(adj, y, w, b)


def dgl_gcn_forward(adj, x, w1, b1, w2, b2):
    """adj: [N,N] dense 0/1 adjacency (f32), x: [N,Fin] f32 -> [N,Fout] f32."""
    n = adj.shape[0]
    fin = x.shape[1]
    gnn = w1.shape[1]
    fout = w2.shape[1]

    # ---- padding for tiling / lane density --------------------------------
    np_ = _round_up(max(n, 8), _LANE)
    tm = 256 if np_ % 256 == 0 else 128
    tk = next(c for c in (1024, 512, 256, 128) if np_ % c == 0)
    tm = min(tm, np_)
    tk = min(tk, np_)

    gnn_p = _round_up(gnn, _LANE)
    fout_p = _round_up(fout, _LANE)

    # A is 0/1 -> bf16 is exact; zero-padded rows get deg=0 -> clamped to 1.
    adj_p = jnp.zeros((np_, np_), jnp.bfloat16).at[:n, :n].set(
        adj.astype(jnp.bfloat16))
    x_p = jnp.zeros((np_, fin), jnp.bfloat16).at[:n, :].set(
        x.astype(jnp.bfloat16))

    w1_p = jnp.zeros((fin, gnn_p), jnp.float32).at[:, :gnn].set(w1)
    b1_p = jnp.zeros((1, gnn_p), jnp.float32).at[0, :gnn].set(b1)
    w2_p = jnp.zeros((gnn_p, fout_p), jnp.float32).at[:gnn, :fout].set(w2)
    b2_p = jnp.zeros((1, fout_p), jnp.float32).at[0, :fout].set(b2)

    # ---- layer 1: GraphConv(in->gnn) + ReLU (Dropout identity in eval) ----
    h = _gcn_layer(adj_p, x_p, w1_p, b1_p, apply_relu=True,
                   out_dtype=jnp.bfloat16, tm=tm, tk=tk)       # [Np, gnn_p] bf16

    # ---- layer 2: GraphConv(gnn->out) --------------------------------------
    out = _gcn_layer(adj_p, h, w2_p, b2_p, apply_relu=False,
                     out_dtype=jnp.float32, tm=tm, tk=tk)      # [Np, fout_p] f32

    return out[:n, :fout]


def _reference(adj, x, w1, b1, w2, b2):
    deg = jnp.maximum(adj.sum(axis=1, keepdims=True), 1.0)
    h = (adj @ (x @ w1)) / deg + b1
    h = jnp.maximum(h, 0.0)
    return (adj @ (h @ w2)) / deg + b2


if __name__ == "__main__":
    # N nodes, in=8, gnn=32, out=8 (N chosen so the tiled grid has >1 step on
    # both axes: Np=768 -> tm=256, tk=256 -> grid (3, 3)).
    N, IN_F, GNN_F, OUT_F = 768, 8, 32, 8

    key = jax.random.PRNGKey(0)
    k_adj, k_x, k_w1, k_b1, k_w2, k_b2 = jax.random.split(key, 6)

    # Random sparse-ish 0/1 adjacency (zero in-degree rows handled by clamp).
    adj = (jax.random.uniform(k_adj, (N, N)) < 0.3).astype(jnp.float32)
    x = jax.random.normal(k_x, (N, IN_F), dtype=jnp.float32)

    def glorot(k, shape):
        lim = (6.0 / (shape[0] + shape[1])) ** 0.5
        return jax.random.uniform(k, shape, jnp.float32, -lim, lim)

    w1 = glorot(k_w1, (IN_F, GNN_F))
    b1 = 0.1 * jax.random.normal(k_b1, (GNN_F,), dtype=jnp.float32)
    w2 = glorot(k_w2, (GNN_F, OUT_F))
    b2 = 0.1 * jax.random.normal(k_b2, (OUT_F,), dtype=jnp.float32)

    out = dgl_gcn_forward(adj, x, w1, b1, w2, b2)
    out = jax.block_until_ready(out)

    ref = _reference(adj, x, w1, b1.reshape(1, -1), w2, b2.reshape(1, -1))
    assert out.shape == (N, OUT_F)
    # bf16 operands + approx reciprocal -> compare with a relative-to-max bound.
    rel_err = float(jnp.max(jnp.abs(out - ref)) / (jnp.max(jnp.abs(ref)) + 1e-6))
    assert rel_err < 2e-2, f"max relative error too large: {rel_err}"

    # TODO(synk): Dropout(0.5) is identity (eval mode); training-mode dropout
    # would use pltpu.prng_seed / pltpu.prng_random_bits.
    print("KERNEL_OK")
</pallas_src>

<mosaic_0001>
module attributes {stable_mosaic.version = 11 : i64} {
  func.func @_gcn_agg_kernel(%arg0: i32, %arg1: i32, %arg2: memref<256x256xbf16, #tpu.memory_space<vmem>>, %arg3: memref<256x8xbf16, #tpu.memory_space<vmem>>, %arg4: memref<8x128xf32, #tpu.memory_space<vmem>>, %arg5: memref<1x128xf32, #tpu.memory_space<vmem>>, %arg6: memref<256x128xbf16, #tpu.memory_space<vmem>>, %arg7: memref<256x8xf32, #tpu.memory_space<vmem>>, %arg8: memref<256x1xf32, #tpu.memory_space<vmem>>) attributes {dimension_semantics = [#tpu.dimension_semantics<parallel>, #tpu.dimension_semantics<arbitrary>], iteration_bounds = array<i64: 3, 3>, scalar_prefetch = 0 : i64, scratch_operands = 2 : i64, tpu.core_type = #tpu.core_type<tc>, window_params = [{transform_indices = @transform_0, window_bounds = array<i64: 256, 256>}, {transform_indices = @transform_1, window_bounds = array<i64: 256, 8>}, {pipeline_mode = #tpu.pipeline_mode<synchronous>, transform_indices = @transform_2, window_bounds = array<i64: 8, 128>}, {pipeline_mode = #tpu.pipeline_mode<synchronous>, transform_indices = @transform_3, window_bounds = array<i64: 1, 128>}, {transform_indices = @transform_4, window_bounds = array<i64: 256, 128>}]} {
    %c0_i32 = arith.constant 0 : i32
    %0 = arith.cmpi eq, %arg1, %c0_i32 : i32
    %1 = arith.extui %0 : i1 to i32
    %c0_i32_0 = arith.constant 0 : i32
    %2 = arith.cmpi ne, %1, %c0_i32_0 : i32
    scf.if %2 {
      %cst_14 = arith.constant 0.000000e+00 : f32
      %18 = vector.broadcast %cst_14 : f32 to vector<256x8xf32>
      %c0_15 = arith.constant 0 : index
      %c0_16 = arith.constant 0 : index
      %19 = vector.load %arg7[%c0_15, %c0_16] : memref<256x8xf32, #tpu.memory_space<vmem>>, vector<256x8xf32>
      tpu.vector_store %arg7[%c0_15, %c0_16], %18 {strides = array<i32>} : memref<256x8xf32, #tpu.memory_space<vmem>>, vector<256x8xf32>,
      %cst_17 = arith.constant 0.000000e+00 : f32
      %20 = vector.broadcast %cst_17 : f32 to vector<256x1xf32>
      %c0_18 = arith.constant 0 : index
      %c0_19 = arith.constant 0 : index
      %21 = vector.load %arg8[%c0_18, %c0_19] : memref<256x1xf32, #tpu.memory_space<vmem>>, vector<256x1xf32>
      tpu.vector_store %arg8[%c0_18, %c0_19], %20 {strides = array<i32>} : memref<256x1xf32, #tpu.memory_space<vmem>>, vector<256x1xf32>,
    } else {
    }
    %c0 = arith.constant 0 : index
    %c0_1 = arith.constant 0 : index
    %3 = vector.load %arg2[%c0, %c0_1] : memref<256x256xbf16, #tpu.memory_space<vmem>>, vector<256x256xbf16>
    %c0_2 = arith.constant 0 : index
    %c0_3 = arith.constant 0 : index
    %4 = vector.load %arg7[%c0_2, %c0_3] : memref<256x8xf32, #tpu.memory_space<vmem>>, vector<256x8xf32>
    %c0_4 = arith.constant 0 : index
    %c0_5 = arith.constant 0 : index
    %5 = vector.load %arg3[%c0_4, %c0_5] : memref<256x8xbf16, #tpu.memory_space<vmem>>, vector<256x8xbf16>
    %cst = arith.constant dense<0.000000e+00> : vector<256x8xf32>
    %6 = tpu.matmul %3, %5, %cst {dimension_numbers = #tpu.dot_dimension_numbers<[1], [0], [0], [1], [0, 0, 1, 1], [], []>} : vector<256x256xbf16>, vector<256x8xbf16>, vector<256x8xf32> -> vector<256x8xf32>
    %7 = arith.addf %4, %6 : vector<256x8xf32>
    %c0_6 = arith.constant 0 : index
    %c0_7 = arith.constant 0 : index
    %8 = vector.load %arg7[%c0_6, %c0_7] : memref<256x8xf32, #tpu.memory_space<vmem>>, vector<256x8xf32>
    tpu.vector_store %arg7[%c0_6, %c0_7], %7 {strides = array<i32>} : memref<256x8xf32, #tpu.memory_space<vmem>>, vector<256x8xf32>,
    %c0_8 = arith.constant 0 : index
    %c0_9 = arith.constant 0 : index
    %9 = vector.load %arg8[%c0_8, %c0_9] : memref<256x1xf32, #tpu.memory_space<vmem>>, vector<256x1xf32>
    %10 = arith.extf %3 : vector<256x256xbf16> to vector<256x256xf32>
    %cst_10 = arith.constant dense<0.000000e+00> : vector<256xf32>
    %11 = vector.multi_reduction <add>, %10, %cst_10 [1] : vector<256x256xf32> to vector<256xf32>
    %12 = vector.shape_cast %11 : vector<256xf32> to vector<256x1xf32>
    %13 = arith.addf %9, %12 : vector<256x1xf32>
    %c0_11 = arith.constant 0 : index
    %c0_12 = arith.constant 0 : index
    %14 = vector.load %arg8[%c0_11, %c0_12] : memref<256x1xf32, #tpu.memory_space<vmem>>, vector<256x1xf32>
    tpu.vector_store %arg8[%c0_11, %c0_12], %13 {strides = array<i32>} : memref<256x1xf32, #tpu.memory_space<vmem>>, vector<256x1xf32>,
    %c2_i32 = arith.constant 2 : i32
    %15 = arith.cmpi eq, %arg1, %c2_i32 : i32
    %16 = arith.extui %15 : i1 to i32
    %c0_i32_13 = arith.constant 0 : i32
    %17 = arith.cmpi ne, %16, %c0_i32_13 : i32
    scf.if %17 {
      %c0_14 = arith.constant 0 : index
      %c0_15 = arith.constant 0 : index
      %18 = vector.load %arg8[%c0_14, %c0_15] : memref<256x1xf32, #tpu.memory_space<vmem>>, vector<256x1xf32>
      %cst_16 = arith.constant 1.000000e+00 : f32
      %19 = vector.broadcast %cst_16 : f32 to vector<256x1xf32>
      %20 = arith.maximumf %18, %19 : vector<256x1xf32>
      %21 = tpu.reciprocal %20 {approx = true} : vector<256x1xf32> -> vector<256x1xf32>
      %c0_17 = arith.constant 0 : index
      %c0_18 = arith.constant 0 : index
      %22 = vector.load %arg7[%c0_17, %c0_18] : memref<256x8xf32, #tpu.memory_space<vmem>>, vector<256x8xf32>
      %23 = vector.broadcast %21 : vector<256x1xf32> to vector<256x8xf32>
      %24 = arith.mulf %22, %23 : vector<256x8xf32>
      %c0_19 = arith.constant 0 : index
      %c0_20 = arith.constant 0 : index
      %25 = vector.load %arg4[%c0_19, %c0_20] : memref<8x128xf32, #tpu.memory_space<vmem>>, vector<8x128xf32>
      %cst_21 = arith.constant dense<0.000000e+00> : vector<256x128xf32>
      %26 = tpu.matmul %24, %25, %cst_21 {dimension_numbers = #tpu.dot_dimension_numbers<[1], [0], [0], [1], [0, 0, 1, 1], [], []>} : vector<256x8xf32>, vector<8x128xf32>, vector<256x128xf32> -> vector<256x128xf32>
      %c0_22 = arith.constant 0 : index
      %c0_23 = arith.constant 0 : index
      %27 = vector.load %arg5[%c0_22, %c0_23] : memref<1x128xf32, #tpu.memory_space<vmem>>, vector<1x128xf32>
      %28 = vector.broadcast %27 : vector<1x128xf32> to vector<256x128xf32>
      %29 = arith.addf %26, %28 : vector<256x128xf32>
      %cst_24 = arith.constant 0.000000e+00 : f32
      %30 = vector.broadcast %cst_24 : f32 to vector<256x128xf32>
      %31 = arith.maximumf %29, %30 : vector<256x128xf32>
      %32 = arith.truncf %31 : vector<256x128xf32> to vector<256x128xbf16>
      %c0_25 = arith.constant 0 : index
      %c0_26 = arith.constant 0 : index
      %33 = vector.load %arg6[%c0_25, %c0_26] : memref<256x128xbf16, #tpu.memory_space<vmem>>, vector<256x128xbf16>
      tpu.vector_store %arg6[%c0_25, %c0_26], %32 {strides = array<i32>} : memref<256x128xbf16, #tpu.memory_space<vmem>>, vector<256x128xbf16>,
    } else {
    }
    return
  }
  func.func @transform_0(%arg0: i32, %arg1: i32) -> (i32, i32) {
    %c0_i32 = arith.constant 0 : i32
    return %arg0, %arg1 : i32, i32
  }
  func.func @transform_1(%arg0: i32, %arg1: i32) -> (i32, i32) {
    %c0_i32 = arith.constant 0 : i32
    %c0_i32_0 = arith.constant 0 : i32
    return %arg1, %c0_i32 : i32, i32
  }
  func.func @transform_2(%arg0: i32, %arg1: i32) -> (i32, i32) {
    %c0_i32 = arith.constant 0 : i32
    %c0_i32_0 = arith.constant 0 : i32
    %c0_i32_1 = arith.constant 0 : i32
    return %c0_i32, %c0_i32_0 : i32, i32
  }
  func.func @transform_3(%arg0: i32, %arg1: i32) -> (i32, i32) {
    %c0_i32 = arith.constant 0 : i32
    %c0_i32_0 = arith.constant 0 : i32
    %c0_i32_1 = arith.constant 0 : i32
    return %c0_i32, %c0_i32_0 : i32, i32
  }
  func.func @transform_4(%arg0: i32, %arg1: i32) -> (i32, i32) {
    %c0_i32 = arith.constant 0 : i32
    %c0_i32_0 = arith.constant 0 : i32
    return %arg0, %c0_i32 : i32, i32
  }
}

</mosaic_0001>

<bundles_post_ra>
// kernel: tpu_custom_call.1
= control target key start
LH: loop header
LB: loop body
LE: loop exit
PB: predicated region body
PF: predicated region fallthrough
CT: control target
= control target key end

     0   :  { %s3919_s0 = inlined_call_operand.hbm [shape: bf16[768,768], index: 0, kind: input, shape index: {}]   ;;  %s3920_s1 = inlined_call_operand.vmem [shape: bf16[768,8], index: 1, kind: input, shape index: {}]   ;;  %s3921_s2 = inlined_call_operand.hbm [shape: f32[8,128], index: 2, kind: input, shape index: {}]   ;;  %s3922_s3 = inlined_call_operand.hbm [shape: f32[1,128], index: 3, kind: input, shape index: {}]   ;;  %s3923_s4 = inlined_call_operand.hbm [shape: bf16[768,128], index: 4, kind: output, shape index: {}]  }
   0x1   :  { %3936 = sst [smem:[#allocation19_spill]] %s3921_s2 }
   0x2   :  { %3937 = sst [smem:[#allocation20_spill]] %s3922_s3 }
   0x3   :  { %9 = vsyncpa [#allocation5], 0 }
   0x4   :  { %11 = vsyncpa [#allocation5 + $0x1], 0 }
   0x5   :  { %12 = vsyncpa [#allocation8], 0 }
   0x6   :  { %13 = vsyncpa [#allocation6], 0 }
   0x7   :  { %15 = vsyncpa [#allocation6 + $0x1], 0  ;;  %s3140_s15 = smov 0   ;;  %s3142_s16 = smov 0  }
   0x8   :  { %s3144_s17 = smov 0   ;;  %s3146_s18 = smov 0  }
   0x9   :  { %s3148_s19 = smov 0   ;;  %s3150_s20 = smov 0  }
   0xa   :  { %s3152_s21 = smov 0   ;;  %s3154_s22 = smov 0  }
   0xb   :  { %s3156_s23 = smov 0   ;;  %s3158_s24 = smov 0  }
   0xc   :  { %s3160_s25 = smov 0  }
   0xd LB: > { %3938 = sst [smem:[#allocation14_spill]] %s3062_s15  ;;  %s2166_s26 = sadd.s32 4294967295, %s3102_s25   ;;  %s3102_s25 = sphi %s3160_s25, %s21_s25   ;;  %s3098_s24 = sphi %s3158_s24, %s3975_s24   ;;  %s3094_s23 = sphi %s3156_s23, %s3974_s23   ;;  %s3090_s22 = sphi %s3154_s22, %s3973_s22   ;;  %s3086_s21 = sphi %s3152_s21, %s3972_s21   ;;  %s3082_s20 = sphi %s3150_s20, %s3971_s20   ;;  %s3078_s19 = sphi %s3148_s19, %s3970_s19   ;;  %s3074_s18 = sphi %s3146_s18, %s3969_s18   ;;  %s3070_s17 = sphi %s3144_s17, %s3968_s17   ;;  %s3066_s16 = sphi %s3142_s16, %s3967_s16   ;;  %s3062_s15 = sphi %s3140_s15, %s3966_s15  }
   0xe   : > { %3939 = sst [smem:[#allocation15_spill]] %s3102_s25  ;;  %s2167_s27 = sadd.s32 4294967294, %s3102_s25  }
   0xf   : > { %p49_p0 = scmp.ne.s32.totalorder %s3082_s20, %s3078_s19  ;;  %p50_p1 = scmp.eq.s32.totalorder %s3102_s25, 0 }
  0x10   : > { %p55_p2 = scmp.ne.s32.totalorder %s3078_s19, %s3074_s18  ;;  %p3200_p3 = scmp.eq.s32.totalorder %s2166_s26, 0 }
  0x11   : > { %p3205_p4 = por %p50_p1, %p49_p0  ;;  %p146_p5 = scmp.ne.s32.totalorder %s3070_s17, %s3066_s16 }
  0x12   : > { %s3940_s29 = scalar_select %p3200_p3, 1, 0 }
  0x13   : > { %p3213_p6 = por %p3200_p3, %p55_p2  ;;  %p147_p7 = scmp.eq.s32.totalorder %s2166_s26, 8 }
  0x14   : > { %p152_p8 = scmp.ne.s32.totalorder %s3066_s16, %s3062_s15  ;;  %p153_p9 = scmp.eq.s32.totalorder %s2167_s27, 8 }
  0x15   : > { %s3942_s6 = scalar_select %p3213_p6, 1, 0 }
  0x16   : > { %p3219_p10 = por %p147_p7, %p146_p5  ;;  %p2168_p11 = scmp.ge.s32.totalorder %s3102_s25, 1 }
  0x17   : > { %p3224_p12 = por %p153_p9, %p152_p8  ;;  %p160_p13 = scmp.lt.s32.totalorder %s3102_s25, 10 }
  0x18   : > { %s3943_s7 = scalar_select %p3219_p10, 1, 0 }
  0x19   : > { %s3944_s8 = scalar_select %p3224_p12, 1, 0 }
  0x1a   : > { %p3229_p0 = pnand %p2168_p11, %p160_p13  ;;  %s3104_s10 = smov [#allocation7]  }
  0x1b   : > { %3945 = sst [smem:[#allocation16_spill]] %s3944_s8  ;;  %s173_s11 = sshll.u32 %s3104_s10, 4  ;;  %s174_s11 = int_to_ptr.vmem [resolvable:$true] %s173_s11 }
  0x1c   : > { %s3946_s9 = scalar_select %p3229_p0, 1, 0 }
  0x1d   : > { %p2658_p1 = pneg %p3229_p0  ;;  %p2675_p2 = scmp.lt.s32.totalorder %s3102_s25, 9 }
  0x1e   : > { %s3105_s14 = smov [#allocation9]   ;;  %s3949_s2 = sld [smem:[#allocation19_spill]] }
  0x1f   : > { %p3238_p5 = pnand %p2658_p1, %p3200_p3  ;;  %p3244_p7 = pnand %p2675_p2, %p3205_p4 }
  0x20   : > { %s184_s18 = sshll.u32 %s3105_s14, 4  ;;  %s185_s18 = int_to_ptr.vmem [resolvable:$true] %s184_s18 }
  0x21   : > { %s3948_s13 = scalar_select %p3244_p7, 1, 0 }
  0x22   : > { %p2892_p9 = pneg %p3238_p5 }
  0x24   : > { %s2890_s10 = scalar_lea.hbm %s3949_s2, 128 }
  0x25   : > { %p2891_p8 = scmp.ne.s32.totalorder %s3949_s2, %s2890_s10  ;;  %p2897_p4 = scmp.lt.u32.totalorder %s2890_s10, %s3949_s2 }
  0x27   : > { %p2893_p11 = pnand %p2892_p9, %p2891_p8 }
  0x29   : > { %p2894_p13 = pneg %p2893_p11 }
  0x2b   : > { %p2899_p1 = pnand %p2897_p4, %p2894_p13 }
  0x2d   : > { %2902 = shalt.err (!%p2899_p1)
}
  0x2e   : > { %s2903_s14 = scalar_lea.vmem %s174_s11, 128  ;;  %p2911_p3 = scmp.lt.s32.totalorder %s174_s11, %s174_s11 }
  0x2f   : > { %p2904_p2 = scmp.ne.s32.totalorder %s174_s11, %s2903_s14  ;;  %p2912_p6 = scmp.lt.s32.totalorder %s2903_s14, %s2903_s14 }
  0x31   : > { %p2906_p12 = pnand %p2904_p2, %p2892_p9  ;;  %p2913_p0 = por %p2912_p6, %p2911_p3 }
  0x33   : > { %p2907_p10 = pneg %p2906_p12 }
  0x35   : > { %p2914_p7 = pnand %p2913_p0, %p2907_p10 }
  0x37   : > { %2917 = shalt.err (!%p2914_p7)
}
  0x38   : > { %2661 = dma.hbm_to_vmem [thread:$0]  (!%p3238_p5), %s3949_s2, 128, %s174_s11, [#allocation8]  }
  0x39   : > { %s3950_s3 = sld [smem:[#allocation20_spill]] }
  0x3f   : > { %s2918_s27 = scalar_lea.hbm %s3950_s3, 16 }
  0x40   : > { %p2919_p12 = scmp.ne.s32.totalorder %s3950_s3, %s2918_s27  ;;  %p2925_p10 = scmp.lt.u32.totalorder %s2918_s27, %s3950_s3 }
  0x42   : > { %p2921_p3 = pnand %p2919_p12, %p2892_p9 }
  0x44   : > { %p2922_p6 = pneg %p2921_p3 }
  0x46   : > { %p2927_p0 = pnand %p2925_p10, %p2922_p6 }
  0x48   : > { %2930 = shalt.err (!%p2927_p0)
}
  0x49   : > { %s2931_s11 = scalar_lea.vmem %s185_s18, 16  ;;  %s2938_s28 = scalar_lea.vmem %s185_s18, 32 }
  0x4a   : > { %p2932_p7 = scmp.ne.s32.totalorder %s185_s18, %s2931_s11  ;;  %p2939_p13 = scmp.lt.s32.totalorder %s185_s18, %s185_s18 }
  0x4b   : > { %p2940_p4 = scmp.lt.s32.totalorder %s2938_s28, %s2931_s11 }
  0x4c   : > { %p2934_p8 = pnand %p2932_p7, %p2892_p9 }
  0x4d   : > { %p2941_p1 = por %p2940_p4, %p2939_p13 }
  0x4e   : > { %p2935_p11 = pneg %p2934_p8 }
  0x50   : > { %p2942_p2 = pnand %p2941_p1, %p2935_p11 }
  0x52   : > { %2945 = shalt.err (!%p2942_p2)
}
  0x53   : > { %2664 = dma.hbm_to_vmem [thread:$0]  (!%p3238_p5), %s3950_s3, 16, %s185_s18, [#allocation8]  }
  0x54   : > { %s33_s8 = sadd.s32 1, %s3098_s24  ;;  %s30_s26 = sadd.s32 1, %s3094_s23 }
  0x55   : > { %s195_s27 = sand.u32 1, %s3082_s20   ;;  %p31_p9 = scmp.ge.s32.totalorder %s30_s26, 3 }
  0x56   : > { %s2172_s10 = sshll.u32 %s195_s27, 8  ;;  %s2174_s5 = sshll.u32 %s3094_s23, 1 }
  0x57   : > { %s3977_s26 = smov (%p31_p9, %s30_s26), 0  ;;  %s3979_s8 = smov (!%p31_p9, %s33_s8), %s3098_s24 }
  0x58   : > { %3951 = sst [smem:[#allocation17_spill]] %s3977_s26  ;;  %s38_s12 = ssub.s32 %s3094_s23, %s3977_s26 }
  0x59   : > { %p35_p12 = scmp.ge.s32.totalorder %s3979_s8, 3  ;;  %s2645_s14 = smul.u32 192, %s3098_s24 }
  0x5a   : > { %s199_s11 = scalar_lea.vmem [#allocation4], %s2172_s10  ;;  %s3953_s10 = sadd.s32 1, %s3070_s17 }
  0x5b   : > { %s209_s18 = sshll.u32 %s199_s11, 4  ;;  %s3981_s8 = smov (%p35_p12, %s3979_s8), 0  ;;  %s3302_s18 = int_to_ptr.vmem [resolvable:$true] %s209_s18 }
  0x5c   : > { %3952 = sst [smem:[#allocation18_spill]] %s3981_s8  ;;  %s206_s28 = sadd.s32 %s2645_s14, %s2174_s5 }
  0x5d   : > { %s37_s30 = ssub.s32 %s3098_s24, %s3981_s8  ;;  %s2176_s15 = sshll.u32 %s206_s28, 6 }
  0x5e   : > { %s39_s2 = sor.u32 %s38_s12, %s37_s30  ;;  %p134_p5 = scmp.eq.s32.totalorder %s37_s30, 0 }
  0x5f   : > { %p40_p3 = scmp.eq.s32.totalorder %s39_s2, 0  ;;  %s3309_s26 = scalar_lea.hbm %s3919_s0, %s2176_s15 }
  0x60   : > { %s3314_s11 = scalar_select %p134_p5, %s3070_s17, %s3953_s10  }
  0x61   : > { %s3954_s5 = sadd.s32 1, %s3082_s20  ;;  %s3321_s8 = scalar_lea.sflag [#allocation5], %s195_s27 }
  0x62   : > { %s3319_s14 = scalar_select %p40_p3, %s3082_s20, %s3954_s5  }
  0x63   : > { %s2946_s12 = scalar_lea.hbm %s3309_s26, 4096  ;;  %p3955_p10 = scmp.ne.s32.totalorder %s3948_s13, 0 }
  0x64   : > { %p2947_p6 = scmp.ne.s32.totalorder %s3309_s26, %s2946_s12  ;;  %s2951_s25 = scalar_lea.hbm %s3919_s0, 36864 }
  0x65   : > { %p2948_p0 = pneg %p3955_p10  ;;  %p2952_p11 = scmp.lt.u32.totalorder %s3309_s26, %s3919_s0 }
  0x66   : > { %p2953_p13 = scmp.lt.u32.totalorder %s2951_s25, %s2946_s12  ;;  %p2955_p1 = scmp.lt.u32.totalorder %s2946_s12, %s3309_s26 }
  0x67   : > { %p2949_p7 = pnand %p2948_p0, %p2947_p6 }
  0x68   : > { %p2954_p4 = por %p2953_p13, %p2952_p11 }
  0x69   : > { %p2950_p8 = pneg %p2949_p7 }
  0x6a   : > { %p2956_p2 = por %p2955_p1, %p2954_p4 }
  0x6c   : > { %p2957_p9 = pnand %p2956_p2, %p2950_p8 }
  0x6e   : > { %2960 = shalt.err (!%p2957_p9)
}
  0x6f   : > { %s2961_s27 = scalar_lea.vmem %s3302_s18, 4096  ;;  %s3106_s15 = smov [#allocation4]  }
  0x70   : > { %p2962_p12 = scmp.ne.s32.totalorder %s3302_s18, %s2961_s27  ;;  %s2966_s10 = sshll.u32 %s3106_s15, 4  ;;  %s2967_s10 = int_to_ptr.vmem [resolvable:$false] %s2966_s10 }
  0x71   : > { %s2968_s5 = scalar_lea.vmem %s2967_s10, 8192  ;;  %p2969_p6 = scmp.lt.s32.totalorder %s3302_s18, %s2967_s10 }
  0x72   : > { %p2964_p5 = pnand %p2962_p12, %p2948_p0  ;;  %p2970_p7 = scmp.lt.s32.totalorder %s2968_s5, %s2961_s27 }
  0x74   : > { %p2965_p3 = pneg %p2964_p5  ;;  %p2971_p11 = por %p2970_p7, %p2969_p6 }
  0x76   : > { %p2972_p13 = pnand %p2971_p11, %p2965_p3 }
  0x78   : > { %2975 = shalt.err (!%p2972_p13)
}
  0x79   : > { %s3107_s12 = smov 384   ;;  %s3108_s2 = smov 128  }
  0x7a   : > { %s3109_s3 = smov 8   ;;  %p3956_p0 = scmp.ne.s32.totalorder %s3946_s9, 0 }
  0x7b   : > { %2668 = dma.hbm_to_vmem [thread:$0]  (!%p3955_p10), %s3309_s26, 4096, %s3302_s18, %s3321_s8, %s3107_s12, %s3108_s2, %s3109_s3  }
  0x7c   : > { %230 = sbr.rel (%p3956_p0) target bundleno = 912 (0x390), region = 36  ;;  %s232_s25 = sand.u32 (!%p3956_p0), 1, %s3078_s19  }
  0x7d   : > { %s2178_s28 = sshll.u32 (!%p3956_p0), %s232_s25, 8  ;;  %s233_s30 = scalar_lea.sflag (!%p3956_p0), [#allocation5], %s232_s25 }
  0x7e   : > { %s3352_s27 = scalar_lea.vmem (!%p3956_p0), [#allocation4], %s2178_s28  ;;  %p3957_p8 = scmp.ne.s32.totalorder (!%p3956_p0), %s3942_s6, 0 }
  0x83   : > { %3049 = dma.done.wait (%p3957_p8), %s233_s30, 4096  }
  0x84   : > { %3051 = vsyncadd (%p3957_p8), %s233_s30, 4294963200  ;;  %p3958_p4 = scmp.ne.s32.totalorder %s3940_s29, 0 }
  0x86   : > { %3053 = dma.done.wait (%p3958_p4), [#allocation8], 144  }
  0x87   : > { %3055 = vsyncadd (%p3958_p4), [#allocation8], 4294967152  ;;  %s271_s9 = sand.u32 1, %s3066_s16   ;;  %s2182_s13 = sshll.u32 %s3086_s21, 5 }
  0x88   : > { %s2181_s8 = sshll.u32 %s271_s9, 7  ;;  %p277_p10 = scmp.lt.s32.totalorder %s2182_s13, 95 }
  0x89   : > { %s3371_s10 = scalar_lea.vmem [#allocation10], %s2181_s8  ;;  %p2184_p1 = scmp.ne.s32.totalorder %s3086_s21, 0 }
  0x8a   : > { %s3983_s13 = smov (!%p277_p10, %s2182_s13), 95  ;;  %vm288_vm0 = vcmask (!%p2184_p1), 64512   ;;  %vm321_vm1 = vcmask (!%p2184_p1), 7168   ;;  %v3110_v0 = vmov (!%p2184_p1), 0.0  }
  0x8b   : > { %s2183_s26 = sshll.u32 %s3983_s13, 2  ;;  %287 = sbr.rel (%p2184_p1) target bundleno = 171 (0xab), region = 52  ;;  %289 = vst.msk [vmem:[#allocation2] sm:$0xff] (!%p2184_p1), %vm288_vm0, %v3110_v0  ;;  %290 = vst.msk [vmem:[#allocation2 + $0x8] sm:$0xff] (!%p2184_p1), %vm288_vm0, %v3110_v0 }
  0x8c   : > { %s3369_s6 = scalar_lea.vmem %s3920_s1, %s2183_s26  ;;  %291 = vst.msk [vmem:[#allocation2 + $0x10] sm:$0xff] (!%p2184_p1), %vm288_vm0, %v3110_v0  ;;  %292 = vst.msk [vmem:[#allocation2 + $0x18] sm:$0xff] (!%p2184_p1), %vm288_vm0, %v3110_v0 }
  0x8d   : > { %293 = vst.msk [vmem:[#allocation2 + $0x20] sm:$0xff] (!%p2184_p1), %vm288_vm0, %v3110_v0  ;;  %294 = vst.msk [vmem:[#allocation2 + $0x28] sm:$0xff] (!%p2184_p1), %vm288_vm0, %v3110_v0 }
  0x8e   : > { %295 = vst.msk [vmem:[#allocation2 + $0x30] sm:$0xff] (!%p2184_p1), %vm288_vm0, %v3110_v0  ;;  %296 = vst.msk [vmem:[#allocation2 + $0x38] sm:$0xff] (!%p2184_p1), %vm288_vm0, %v3110_v0 }
  0x8f   : > { %297 = vst.msk [vmem:[#allocation2 + $0x40] sm:$0xff] (!%p2184_p1), %vm288_vm0, %v3110_v0  ;;  %298 = vst.msk [vmem:[#allocation2 + $0x48] sm:$0xff] (!%p2184_p1), %vm288_vm0, %v3110_v0 }
  0x90   : > { %299 = vst.msk [vmem:[#allocation2 + $0x50] sm:$0xff] (!%p2184_p1), %vm288_vm0, %v3110_v0  ;;  %300 = vst.msk [vmem:[#allocation2 + $0x58] sm:$0xff] (!%p2184_p1), %vm288_vm0, %v3110_v0 }
  0x91   : > { %301 = vst.msk [vmem:[#allocation2 + $0x60] sm:$0xff] (!%p2184_p1), %vm288_vm0, %v3110_v0  ;;  %302 = vst.msk [vmem:[#allocation2 + $0x68] sm:$0xff] (!%p2184_p1), %vm288_vm0, %v3110_v0 }
  0x92   : > { %303 = vst.msk [vmem:[#allocation2 + $0x70] sm:$0xff] %vm288_vm0, %v3110_v0  ;;  %304 = vst.msk [vmem:[#allocation2 + $0x78] sm:$0xff] %vm288_vm0, %v3110_v0 }
  0x93   : > { %305 = vst.msk [vmem:[#allocation2 + $0x80] sm:$0xff] %vm288_vm0, %v3110_v0  ;;  %306 = vst.msk [vmem:[#allocation2 + $0x88] sm:$0xff] %vm288_vm0, %v3110_v0 }
  0x94   : > { %307 = vst.msk [vmem:[#allocation2 + $0x90] sm:$0xff] %vm288_vm0, %v3110_v0  ;;  %308 = vst.msk [vmem:[#allocation2 + $0x98] sm:$0xff] %vm288_vm0, %v3110_v0 }
  0x95   : > { %309 = vst.msk [vmem:[#allocation2 + $0xa0] sm:$0xff] %vm288_vm0, %v3110_v0  ;;  %310 = vst.msk [vmem:[#allocation2 + $0xa8] sm:$0xff] %vm288_vm0, %v3110_v0 }
  0x96   : > { %311 = vst.msk [vmem:[#allocation2 + $0xb0] sm:$0xff] %vm288_vm0, %v3110_v0  ;;  %312 = vst.msk [vmem:[#allocation2 + $0xb8] sm:$0xff] %vm288_vm0, %v3110_v0 }
  0x97   : > { %313 = vst.msk [vmem:[#allocation2 + $0xc0] sm:$0xff] %vm288_vm0, %v3110_v0  ;;  %314 = vst.msk [vmem:[#allocation2 + $0xc8] sm:$0xff] %vm288_vm0, %v3110_v0 }
  0x98   : > { %315 = vst.msk [vmem:[#allocation2 + $0xd0] sm:$0xff] %vm288_vm0, %v3110_v0  ;;  %316 = vst.msk [vmem:[#allocation2 + $0xd8] sm:$0xff] %vm288_vm0, %v3110_v0 }
  0x99   : > { %317 = vst.msk [vmem:[#allocation2 + $0xe0] sm:$0xff] %vm288_vm0, %v3110_v0  ;;  %318 = vst.msk [vmem:[#allocation2 + $0xe8] sm:$0xff] %vm288_vm0, %v3110_v0 }
  0x9a   : > { %319 = vst.msk [vmem:[#allocation2 + $0xf0] sm:$0xff] %vm288_vm0, %v3110_v0  ;;  %320 = vst.msk [vmem:[#allocation2 + $0xf8] sm:$0xff] %vm288_vm0, %v3110_v0 }
  0x9b   : > { %322 = vst.msk [vmem:[#allocation3] sm:$0xff] %vm321_vm1, %v3110_v0  ;;  %323 = vst.msk [vmem:[#allocation3 + $0x8] sm:$0xff] %vm321_vm1, %v3110_v0 }
  0x9c   : > { %324 = vst.msk [vmem:[#allocation3 + $0x10] sm:$0xff] %vm321_vm1, %v3110_v0  ;;  %325 = vst.msk [vmem:[#allocation3 + $0x18] sm:$0xff] %vm321_vm1, %v3110_v0 }
  0x9d   : > { %326 = vst.msk [vmem:[#allocation3 + $0x20] sm:$0xff] %vm321_vm1, %v3110_v0  ;;  %327 = vst.msk [vmem:[#allocation3 + $0x28] sm:$0xff] %vm321_vm1, %v3110_v0 }
  0x9e   : > { %328 = vst.msk [vmem:[#allocation3 + $0x30] sm:$0xff] %vm321_vm1, %v3110_v0  ;;  %329 = vst.msk [vmem:[#allocation3 + $0x38] sm:$0xff] %vm321_vm1, %v3110_v0 }
  0x9f   : > { %330 = vst.msk [vmem:[#allocation3 + $0x40] sm:$0xff] %vm321_vm1, %v3110_v0  ;;  %331 = vst.msk [vmem:[#allocation3 + $0x48] sm:$0xff] %vm321_vm1, %v3110_v0 }
  0xa0   : > { %332 = vst.msk [vmem:[#allocation3 + $0x50] sm:$0xff] %vm321_vm1, %v3110_v0  ;;  %333 = vst.msk [vmem:[#allocation3 + $0x58] sm:$0xff] %vm321_vm1, %v3110_v0 }
  0xa1   : > { %334 = vst.msk [vmem:[#allocation3 + $0x60] sm:$0xff] %vm321_vm1, %v3110_v0  ;;  %335 = vst.msk [vmem:[#allocation3 + $0x68] sm:$0xff] %vm321_vm1, %v3110_v0 }
  0xa2   : > { %336 = vst.msk [vmem:[#allocation3 + $0x70] sm:$0xff] %vm321_vm1, %v3110_v0  ;;  %337 = vst.msk [vmem:[#allocation3 + $0x78] sm:$0xff] %vm321_vm1, %v3110_v0 }
  0xa3   : > { %338 = vst.msk [vmem:[#allocation3 + $0x80] sm:$0xff] %vm321_vm1, %v3110_v0  ;;  %339 = vst.msk [vmem:[#allocation3 + $0x88] sm:$0xff] %vm321_vm1, %v3110_v0 }
  0xa4   : > { %340 = vst.msk [vmem:[#allocation3 + $0x90] sm:$0xff] %vm321_vm1, %v3110_v0  ;;  %341 = vst.msk [vmem:[#allocation3 + $0x98] sm:$0xff] %vm321_vm1, %v3110_v0 }
  0xa5   : > { %342 = vst.msk [vmem:[#allocation3 + $0xa0] sm:$0xff] %vm321_vm1, %v3110_v0  ;;  %343 = vst.msk [vmem:[#allocation3 + $0xa8] sm:$0xff] %vm321_vm1, %v3110_v0 }
  0xa6   : > { %344 = vst.msk [vmem:[#allocation3 + $0xb0] sm:$0xff] %vm321_vm1, %v3110_v0  ;;  %345 = vst.msk [vmem:[#allocation3 + $0xb8] sm:$0xff] %vm321_vm1, %v3110_v0 }
  0xa7   : > { %346 = vst.msk [vmem:[#allocation3 + $0xc0] sm:$0xff] %vm321_vm1, %v3110_v0  ;;  %347 = vst.msk [vmem:[#allocation3 + $0xc8] sm:$0xff] %vm321_vm1, %v3110_v0 }
  0xa8   : > { %348 = vst.msk [vmem:[#allocation3 + $0xd0] sm:$0xff] %vm321_vm1, %v3110_v0  ;;  %349 = vst.msk [vmem:[#allocation3 + $0xd8] sm:$0xff] %vm321_vm1, %v3110_v0 }
  0xa9   : > { %350 = vst.msk [vmem:[#allocation3 + $0xe0] sm:$0xff] %vm321_vm1, %v3110_v0  ;;  %351 = vst.msk [vmem:[#allocation3 + $0xe8] sm:$0xff] %vm321_vm1, %v3110_v0 }
  0xaa   : > { %352 = vst.msk [vmem:[#allocation3 + $0xf0] sm:$0xff] %vm321_vm1, %v3110_v0  ;;  %353 = vst.msk [vmem:[#allocation3 + $0xf8] sm:$0xff] %vm321_vm1, %v3110_v0 }
  0xab PF: > { %v2776_v1 = vld [vmem:[%s3369_s6 + $0x40] sm:$0xff]   ;;  %v2778_v3 = vld [vmem:[%s3369_s6 + $0x48] sm:$0xff]   ;;  %v2780_v5 = vld [vmem:[%s3369_s6 + $0x50] sm:$0xff]   ;;  %vm1156_vm2 = vcmask 7168   ;;  %vm899_vm3 = vcmask 64512   ;;  %p2233_p2 = scmp.ne.s32.totalorder %s3086_s21, 2 }
  0xac   : > { %v2777_v2 = vld [vmem:[%s3369_s6] sm:$0xff]   ;;  %2432 = vmatprep.subr.bf16.mxu0 %v2776_v1  ;;  %2627 = vmatprep.subr.bf16.mxu1 %v2776_v1  ;;  %v2779_v4 = vld [vmem:[%s3369_s6 + $0x8] sm:$0xff]   ;;  %v2781_v6 = vld [vmem:[%s3369_s6 + $0x10] sm:$0xff]  }
  0xad   : > { %2433 = vmatpush3.bf16.msra.mxu0 %v2777_v2  ;;  %2635 = vmatpush3.bf16.msra.mxu1 %v2777_v2  ;;  %v2782_v7 = vld [vmem:[%s3369_s6 + $0x58] sm:$0xff]   ;;  %v2784_v9 = vld [vmem:[%s3369_s6 + $0x60] sm:$0xff]   ;;  %v2786_v11 = vld [vmem:[%s3369_s6 + $0x68] sm:$0xff]  }
  0xae   : > { %2434 = vmatprep.subr.bf16.mxu0 %v2778_v3  ;;  %2628 = vmatprep.subr.bf16.mxu1 %v2778_v3  ;;  %v2783_v8 = vld [vmem:[%s3369_s6 + $0x18] sm:$0xff]   ;;  %v2785_v10 = vld [vmem:[%s3369_s6 + $0x20] sm:$0xff]   ;;  %v3517_v13 = vld [vmem:[%s3352_s27 + $0x8] sm:$0xff] }
  0xaf   : > { %v3514_v12 = vld [vmem:[%s3352_s27] sm:$0xff]  ;;  %v3525_v16 = vld [vmem:[%s3352_s27 + $0x88] sm:$0xff]  ;;  %v3530_v18 = vld [vmem:[%s3352_s27 + $0x10] sm:$0xff]  ;;  %v966_v31 = vunpack.c.l.bf16 %v3517_v13  ;;  %v967_v32 = vunpack.c.h.bf16 %v3517_v13 }
  0xb0   : > { %v3520_v14 = vld [vmem:[%s3352_s27 + $0x80] sm:$0xff]  ;;  %v2186_v15 = vcombine.high %v3514_v12, %v3517_v13  ;;  %v2787_v19 = vld [vmem:[%s3369_s6 + $0x28] sm:$0xff]   ;;  %v968_v20 = vunpack.c.l.bf16 %v3530_v18  ;;  %v969_v21 = vunpack.c.h.bf16 %v3530_v18  ;;  %v2788_v22 = vld [vmem:[%s3369_s6 + $0x70] sm:$0xff]   ;;  %v964_v23 = vunpack.c.l.bf16 %v3514_v12 }
  0xb1   : > { %2435 = vmatpush3.bf16.msra.mxu0 %v2779_v4  ;;  %2636 = vmatpush3.bf16.msra.mxu1 %v2779_v4  ;;  %v2202_v17 = vcombine.high %v3520_v14, %v3525_v16  ;;  %v965_v24 = vunpack.c.h.bf16 %v3514_v12  ;;  %v3539_v25 = vld [vmem:[%s3352_s27 + $0x18] sm:$0xff]  ;;  %v2789_v26 = vld [vmem:[%s3369_s6 + $0x30] sm:$0xff]   ;;  %v3548_v34 = vld [vmem:[%s3352_s27 + $0x28] sm:$0xff]  ;;  %v1031_v42 = vadd.f32 %v967_v32, %v966_v31  ;;  %v2185_v48 = vcombine.low %v3514_v12, %v3517_v13 }
  0xb2   : > { %2436 = vmatprep.subr.bf16.mxu0 %v2780_v5  ;;  %2629 = vmatprep.subr.bf16.mxu1 %v2780_v5  ;;  %v1034_v27 = vadd.f32 %v969_v21, %v968_v20  ;;  %v970_v28 = vunpack.c.l.bf16 %v3539_v25  ;;  %v971_v29 = vunpack.c.h.bf16 %v3539_v25  ;;  %v2790_v30 = vld [vmem:[%s3369_s6 + $0x78] sm:$0xff]   ;;  %v3552_v36 = vld [vmem:[%s3352_s27 + $0x90] sm:$0xff]  ;;  %v974_v38 = vunpack.c.l.bf16 %v3548_v34  ;;  %v3559_v40 = vld [vmem:[%s3352_s27 + $0x20] sm:$0xff] }
  0xb3   : > { %738 = vmatprep.mubr.bf16.mxu0 %v2186_v15  ;;  %802 = vmatprep.mubr.bf16.mxu1 %v2202_v17  ;;  %v1028_v33 = vadd.f32 %v965_v24, %v964_v23  ;;  %v2791_v35 = vld [vmem:[%s3369_s6 + $0x38] sm:$0xff]   ;;  %v975_v43 = vunpack.c.h.bf16 %v3548_v34  ;;  %v972_v44 = vunpack.c.l.bf16 %v3559_v40  ;;  %v973_v45 = vunpack.c.h.bf16 %v3559_v40  ;;  %v3578_v53 = vld [vmem:[%s3352_s27 + $0x30] sm:$0xff]  ;;  %v3581_v54 = vld [vmem:[%s3352_s27 + $0x48] sm:$0xff] }
  0xb4   : > { %1035 = vadd.xlane.f32.xlu1 %v1034_v27  ;;  %v1037_v37 = vadd.f32 %v971_v29, %v970_v28  ;;  %v3556_v39 = vld [vmem:[%s3352_s27 + $0x98] sm:$0xff]  ;;  %v2201_v49 = vcombine.low %v3520_v14, %v3525_v16  ;;  %v2188_v51 = vcombine.high %v3530_v18, %v3539_v25  ;;  %v976_v55 = vunpack.c.l.bf16 %v3578_v53  ;;  %v3588_v61 = vld [vmem:[%s3352_s27 + $0x40] sm:$0xff]  ;;  %v3594_v63 = vld [vmem:[%s3352_s27 + $0xa8] sm:$0xff] }
  0xb5   : > { %2437 = vmatpush3.bf16.msra.mxu0 %v2781_v6  ;;  %2637 = vmatpush3.bf16.msra.mxu1 %v2781_v6  ;;  %v3562_v41 = vld [vmem:[%s3352_s27 + $0x38] sm:$0xff]  ;;  %v1043_v50 = vadd.f32 %v975_v43, %v974_v38  ;;  %v2204_v52 = vcombine.high %v3552_v36, %v3556_v39  ;;  %v977_v56 = vunpack.c.h.bf16 %v3578_v53  ;;  %v1040_v57 = vadd.f32 %v973_v45, %v972_v44  ;;  %v3591_v62 = vld [vmem:[%s3352_s27 + $0xa0] sm:$0xff]  ;;  %v3615_v12 = vld [vmem:[%s3352_s27 + $0x68] sm:$0xff] }
  0xb6   : > { %2438 = vmatprep.subr.bf16.mxu0 %v2782_v7  ;;  %2630 = vmatprep.subr.bf16.mxu1 %v2782_v7  ;;  %v978_v46 = vunpack.c.l.bf16 %v3562_v41  ;;  %v979_v47 = vunpack.c.h.bf16 %v3562_v41  ;;  %v982_v59 = vunpack.c.l.bf16 %v3581_v54  ;;  %v983_v60 = vunpack.c.h.bf16 %v3581_v54  ;;  %v3597_v0 = vld [vmem:[%s3352_s27 + $0x58] sm:$0xff]  ;;  %v3622_v21 = vld [vmem:[%s3352_s27 + $0x60] sm:$0xff] }
  0xb7   : > { %1029 = vadd.xlane.f32.xlu0 %v1028_v33  ;;  %v980_v1 = vunpack.c.l.bf16 %v3588_v61  ;;  %v981_v2 = vunpack.c.h.bf16 %v3588_v61  ;;  %v1046_v3 = vadd.f32 %v977_v56, %v976_v55  ;;  %v986_v5 = vunpack.c.l.bf16 %v3597_v0  ;;  %v3628_v23 = vld [vmem:[%s3352_s27 + $0xb8] sm:$0xff]  ;;  %v3653_v45 = vld [vmem:[%s3352_s27 + $0xc0] sm:$0xff] }
  0xb8   : > { %1038 = vadd.xlane.f32.xlu1 %v1037_v37  ;;  %v1049_v58 = vadd.f32 %v979_v47, %v978_v46  ;;  %v1055_v4 = vadd.f32 %v983_v60, %v982_v59  ;;  %v987_v6 = vunpack.c.h.bf16 %v3597_v0  ;;  %v2187_v7 = vcombine.low %v3530_v18, %v3539_v25  ;;  %v3631_v24 = vld [vmem:[%s3352_s27 + $0x78] sm:$0xff]  ;;  %v3646_v37 = vld [vmem:[%s3352_s27 + $0x70] sm:$0xff]  ;;  %v379_v46 = vld [vmem:[%s3352_s27 + $0xc8] sm:$0xff] }
  0xb9   : > { %2439 = vmatpush3.bf16.msra.mxu0 %v2783_v8  ;;  %2638 = vmatpush3.bf16.msra.mxu1 %v2783_v8  ;;  %v2203_v8 = vcombine.low %v3552_v36, %v3556_v39  ;;  %v1052_v13 = vadd.f32 %v981_v2, %v980_v1  ;;  %v991_v20 = vunpack.c.h.bf16 %v3615_v12  ;;  %v988_v25 = vunpack.c.l.bf16 %v3622_v21  ;;  %v380_v60 = vld [vmem:[%s3352_s27 + $0xd0] sm:$0xff]  ;;  %v381_v1 = vld [vmem:[%s3352_s27 + $0xd8] sm:$0xff] }
  0xba   : > { %2440 = vmatprep.subr.bf16.mxu0 %v2784_v9  ;;  %2631 = vmatprep.subr.bf16.mxu1 %v2784_v9  ;;  %v2190_v9 = vcombine.high %v3559_v40, %v3548_v34  ;;  %v1061_v17 = vadd.f32 %v987_v6, %v986_v5  ;;  %v994_v29 = vunpack.c.l.bf16 %v3631_v24  ;;  %v2189_v31 = vcombine.low %v3559_v40, %v3548_v34 }
  0xbb   : > { %1032 = vadd.xlane.f32.xlu0 %v1031_v42  ;;  %v2205_v32 = vcombine.low %v3591_v62, %v3594_v63  ;;  %v2192_v33 = vcombine.high %v3578_v53, %v3562_v41  ;;  %v992_v42 = vunpack.c.l.bf16 %v3646_v37  ;;  %v993_v34 = vunpack.c.h.bf16 %v3646_v37 }
  0xbc   : > { %1044 = vadd.xlane.f32.xlu1 %v1043_v50  ;;  %v998_v40 = vunpack.c.l.bf16 %v3525_v16  ;;  %v999_v44 = vunpack.c.h.bf16 %v3525_v16  ;;  %v996_v47 = vunpack.c.l.bf16 %v3520_v14  ;;  %v2191_v16 = vcombine.low %v3578_v53, %v3562_v41 }
  0xbd   : > { %2441 = vmatpush3.bf16.msra.mxu0 %v2785_v10  ;;  %2639 = vmatpush3.bf16.msra.mxu1 %v2785_v10  ;;  %v2206_v10 = vcombine.high %v3591_v62, %v3594_v63  ;;  %v2194_v56 = vcombine.high %v3588_v61, %v3581_v54  ;;  %v1006_v41 = vunpack.c.l.bf16 %v3594_v63  ;;  %v1007_v53 = vunpack.c.h.bf16 %v3594_v63 }
  0xbe   : > { %2442 = vmatprep.subr.bf16.mxu0 %v2786_v11  ;;  %2632 = vmatprep.subr.bf16.mxu1 %v2786_v11  ;;  %v3612_v11 = vld [vmem:[%s3352_s27 + $0x50] sm:$0xff]  ;;  %v1079_v50 = vadd.f32 %v999_v44, %v998_v40  ;;  %v1004_v2 = vunpack.c.l.bf16 %v3591_v62  ;;  %v1011_v6 = vunpack.c.h.bf16 %v3628_v23  ;;  %v2193_v63 = vcombine.low %v3588_v61, %v3581_v54  ;;  %v382_v54 = vld [vmem:[%s3352_s27 + $0xe0] sm:$0xff]  ;;  %v383_v61 = vld [vmem:[%s3352_s27 + $0xe8] sm:$0xff] }
  0xbf   : > { %1041 = vadd.xlane.f32.xlu0 %v1040_v57  ;;  %v984_v15 = vunpack.c.l.bf16 %v3612_v11  ;;  %v985_v18 = vunpack.c.h.bf16 %v3612_v11  ;;  %v1091_v5 = vadd.f32 %v1007_v53, %v1006_v41 }
  0xc0   : > { %1050 = vadd.xlane.f32.xlu1 %v1049_v58  ;;  %v1000_v58 = vunpack.c.l.bf16 %v3552_v36 }
  0xc1   : > { %2443 = vmatpush3.bf16.msra.mxu0 %v2787_v19  ;;  %2640 = vmatpush3.bf16.msra.mxu1 %v2787_v19  ;;  %v990_v19 = vunpack.c.l.bf16 %v3615_v12  ;;  %v1058_v27 = vadd.f32 %v985_v18, %v984_v15  ;;  %v1015_v18 = vunpack.c.h.bf16 %v379_v46 }
  0xc2   : > { %2444 = vmatprep.subr.bf16.mxu0 %v2788_v22  ;;  %2633 = vmatprep.subr.bf16.mxu1 %v2788_v22  ;;  %v3625_v22 = vld [vmem:[%s3352_s27 + $0xb0] sm:$0xff] }
  0xc3   : > { %1047 = vadd.xlane.f32.xlu0 %v1046_v3  ;;  %v1067_v28 = vadd.f32 %v991_v20, %v990_v19  ;;  %v2207_v55 = vcombine.low %v3625_v22, %v3628_v23  ;;  %v1005_v3 = vunpack.c.h.bf16 %v3591_v62  ;;  %v1009_v15 = vunpack.c.h.bf16 %v3625_v22 }
  0xc4   : > { %1056 = vadd.xlane.f32.xlu1 %v1055_v4  ;;  %v1012_v19 = vunpack.c.l.bf16 %v3653_v45  ;;  %v1013_v20 = vunpack.c.h.bf16 %v3653_v45 }
  0xc5   : > { %2445 = vmatpush3.bf16.msra.mxu0 %v2789_v26  ;;  %2641 = vmatpush3.bf16.msra.mxu1 %v2789_v26  ;;  %v989_v26 = vunpack.c.h.bf16 %v3622_v21  ;;  %v1088_v62 = vadd.f32 %v1005_v3, %v1004_v2  ;;  %v933_v2 = vld [vmem:[#allocation3 + $0x8] sm:$0xff] }
  0xc6   : > { %2446 = vmatprep.subr.bf16.mxu0 %v2790_v30  ;;  %2634 = vmatprep.subr.bf16.mxu1 %v2790_v30  ;;  %v995_v30 = vunpack.c.h.bf16 %v3631_v24  ;;  %v937_v3 = vld [vmem:[#allocation3 + $0x28] sm:$0xff] }
  0xc7   : > { %1053 = vadd.xlane.f32.xlu0 %v1052_v13  ;;  %v1064_v38 = vadd.f32 %v989_v26, %v988_v25  ;;  %v1018_v26 = vunpack.c.l.bf16 %v381_v1 }
  0xc8   : > { %1062 = vadd.xlane.f32.xlu1 %v1061_v17  ;;  %v1073_v43 = vadd.f32 %v995_v30, %v994_v29  ;;  %v1014_v17 = vunpack.c.l.bf16 %v379_v46  ;;  %v2198_v29 = vcombine.high %v3622_v21, %v3615_v12  ;;  %v2214_v30 = vcombine.high %v382_v54, %v383_v61 }
  0xc9   : > { %2447 = vmatpush3.bf16.msra.mxu0 %v2791_v35  ;;  %2642 = vmatpush3.bf16.msra.mxu1 %v2791_v35  ;;  %v2208_v35 = vcombine.high %v3625_v22, %v3628_v23 }
  0xca   : > { %v1103_v25 = vadd.f32 %v1015_v18, %v1014_v17 }
  0xcb   : > { %1059 = vadd.xlane.f32.xlu0 %v1058_v27  ;;  %v1019_v27 = vunpack.c.h.bf16 %v381_v1 }
  0xcc   : > { %739 = vmatmul.mubr.bf16.vlgmr.msra.gmra.mrb[0].mxu0 %v2185_v48  ;;  %803 = vmatmul.mubr.bf16.vlgmr.msra.gmra.mrb[0].mxu1 %v2201_v49  ;;  %v997_v48 = vunpack.c.h.bf16 %v3520_v14  ;;  %v1070_v49 = vadd.f32 %v993_v34, %v992_v42  ;;  %v2210_v14 = vcombine.high %v3653_v45, %v379_v46  ;;  %v1023_v42 = vunpack.c.h.bf16 %v383_v61 }
  0xcd   : > { %746 = vmatprep.mubr.bf16.mxu0 %v2188_v51  ;;  %810 = vmatprep.mubr.bf16.mxu1 %v2204_v52  ;;  %v1002_v51 = vunpack.c.l.bf16 %v3556_v39  ;;  %v1003_v52 = vunpack.c.h.bf16 %v3556_v39  ;;  %v1001_v39 = vunpack.c.h.bf16 %v3552_v36  ;;  %v1010_v36 = vunpack.c.l.bf16 %v3628_v23 }
  0xce   : > { %1068 = vadd.xlane.f32.xlu1 %v1067_v28  ;;  %v1076_v57 = vadd.f32 %v997_v48, %v996_v47  ;;  %v2211_v28 = vcombine.low %v380_v60, %v381_v1  ;;  %v1021_v34 = vunpack.c.h.bf16 %v382_v54  ;;  %v2197_v47 = vcombine.low %v3622_v21, %v3615_v12 }
  0xcf   : > { %1065 = vadd.xlane.f32.xlu0 %v1064_v38  ;;  %v1085_v59 = vadd.f32 %v1003_v52, %v1002_v51  ;;  %v1082_v4 = vadd.f32 %v1001_v39, %v1000_v58  ;;  %v1097_v13 = vadd.f32 %v1011_v6, %v1010_v36  ;;  %v1022_v38 = vunpack.c.l.bf16 %v383_v61  ;;  %v935_v39 = vld [vmem:[#allocation3 + $0x18] sm:$0xff]  ;;  %v936_v36 = vld [vmem:[#allocation3 + $0x20] sm:$0xff] }
  0xd0   : > { %v2213_v48 = vcombine.low %v382_v54, %v383_v61  ;;  %v2199_v12 = vcombine.low %v3646_v37, %v3631_v24  ;;  %v939_v6 = vld [vmem:[#allocation3 + $0x38] sm:$0xff] }
  0xd1   : > { %v1115_v44 = vadd.f32 %v1023_v42, %v1022_v38  ;;  %v943_v61 = vld [vmem:[#allocation3 + $0x58] sm:$0xff] }
  0xd2   : > { %1074 = vadd.xlane.f32.xlu1 %v1073_v43  ;;  %v1020_v43 = vunpack.c.l.bf16 %v382_v54  ;;  %v940_v54 = vld [vmem:[#allocation3 + $0x40] sm:$0xff] }
  0xd3   : > { %1071 = vadd.xlane.f32.xlu0 %v1070_v49  ;;  %v2200_v49 = vcombine.high %v3646_v37, %v3631_v24 }
  0xd4   : > { %747 = vmatmul.mubr.bf16.gmra.mrb[4].mxu0 %v2187_v7  ;;  %811 = vmatmul.mubr.bf16.gmra.mrb[4].mxu1 %v2203_v8  ;;  %v2209_v7 = vcombine.low %v3653_v45, %v379_v46  ;;  %v2196_v8 = vcombine.high %v3612_v11, %v3597_v0  ;;  %v1112_v51 = vadd.f32 %v1021_v34, %v1020_v43 }
  0xd5   : > { %754 = vmatprep.mubr.bf16.mxu0 %v2190_v9  ;;  %818 = vmatprep.mubr.bf16.mxu1 %v2206_v10  ;;  %v2212_v9 = vcombine.high %v380_v60, %v381_v1  ;;  %v1008_v10 = vunpack.c.l.bf16 %v3625_v22  ;;  %v2195_v22 = vcombine.low %v3612_v11, %v3597_v0  ;;  %v384_v0 = vld [vmem:[%s3352_s27 + $0xf0] sm:$0xff]  ;;  %v385_v11 = vld [vmem:[%s3352_s27 + $0xf8] sm:$0xff] }
  0xd6   : > { %1080 = vadd.xlane.f32.xlu1 %v1079_v50  ;;  %v1026_v45 = vunpack.c.l.bf16 %v385_v11  ;;  %v1027_v46 = vunpack.c.h.bf16 %v385_v11  ;;  %v2216_v50 = vcombine.high %v384_v0, %v385_v11  ;;  %v2215_v21 = vcombine.low %v384_v0, %v385_v11  ;;  %v949_v11 = vld [vmem:[#allocation3 + $0x88] sm:$0xff] }
  0xd7   : > { %1077 = vadd.xlane.f32.xlu0 %v1076_v57  ;;  %v1094_v23 = vadd.f32 %v1009_v15, %v1008_v10  ;;  %v941_v10 = vld [vmem:[#allocation3 + $0x48] sm:$0xff] }
  0xd8   : > { %v1121_v52 = vadd.f32 %v1027_v46, %v1026_v45  ;;  %v948_v45 = vld [vmem:[#allocation3 + $0x80] sm:$0xff]  ;;  %v951_v46 = vld [vmem:[#allocation3 + $0x98] sm:$0xff] }
  0xda   : > { %1086 = vadd.xlane.f32.xlu1 %v1085_v59  ;;  %v932_v59 = vld [vmem:[#allocation3] sm:$0xff] }
  0xdb   : > { %1083 = vadd.xlane.f32.xlu0 %v1082_v4 }
  0xdc   : > { %755 = vmatmul.mubr.bf16.gmra.mrb[8].mxu0 %v2189_v31  ;;  %819 = vmatmul.mubr.bf16.gmra.mrb[8].mxu1 %v2205_v32  ;;  %v1100_v31 = vadd.f32 %v1013_v20, %v1012_v19  ;;  %v1016_v32 = vunpack.c.l.bf16 %v380_v60 }
  0xdd   : > { %762 = vmatprep.mubr.bf16.mxu0 %v2192_v33  ;;  %826 = vmatprep.mubr.bf16.mxu1 %v2208_v35  ;;  %v1109_v33 = vadd.f32 %v1019_v27, %v1018_v26  ;;  %v1017_v35 = vunpack.c.h.bf16 %v380_v60  ;;  %v942_v26 = vld [vmem:[#allocation3 + $0x50] sm:$0xff]  ;;  %v945_v27 = vld [vmem:[#allocation3 + $0x68] sm:$0xff] }
  0xde   : > { %1092 = vadd.xlane.f32.xlu1 %v1091_v5 }
  0xdf   : > { %1089 = vadd.xlane.f32.xlu0 %v1088_v62  ;;  %v1106_v40 = vadd.f32 %v1017_v35, %v1016_v32  ;;  %v938_v62 = vld [vmem:[#allocation3 + $0x30] sm:$0xff]  ;;  %v947_v32 = vld [vmem:[#allocation3 + $0x78] sm:$0xff] }
  0xe2   : > { %1098 = vadd.xlane.f32.xlu1 %v1097_v13 }
  0xe3   : > { %1095 = vadd.xlane.f32.xlu0 %v1094_v23 }
  0xe4   : > { %763 = vmatmul.mubr.bf16.gmra.mrb[12].mxu0 %v2191_v16  ;;  %827 = vmatmul.mubr.bf16.gmra.mrb[12].mxu1 %v2207_v55  ;;  %v1024_v16 = vunpack.c.l.bf16 %v384_v0  ;;  %v1025_v55 = vunpack.c.h.bf16 %v384_v0  ;;  %v946_v0 = vld [vmem:[#allocation3 + $0x70] sm:$0xff] }
  0xe5   : > { %770 = vmatprep.mubr.bf16.mxu0 %v2194_v56  ;;  %834 = vmatprep.mubr.bf16.mxu1 %v2210_v14  ;;  %v934_v14 = vld [vmem:[#allocation3 + $0x10] sm:$0xff] }
  0xe6   : > { %1104 = vadd.xlane.f32.xlu1 %v1103_v25  ;;  %v1118_v56 = vadd.f32 %v1025_v55, %v1024_v16 }
  0xe7   : > { %1101 = vadd.xlane.f32.xlu0 %v1100_v31  ;;  %v944_v31 = vld [vmem:[#allocation3 + $0x60] sm:$0xff] }
  0xea   : > { %1110 = vadd.xlane.f32.xlu1 %v1109_v33 }
  0xeb   : > { %1107 = vadd.xlane.f32.xlu0 %v1106_v40 }
  0xec   : > { %771 = vmatmul.mubr.bf16.gmra.mrb[16].mxu0 %v2193_v63  ;;  %835 = vmatmul.mubr.bf16.gmra.mrb[16].mxu1 %v2209_v7 }
  0xed   : > { %778 = vmatprep.mubr.bf16.mxu0 %v2196_v8  ;;  %842 = vmatprep.mubr.bf16.mxu1 %v2212_v9 }
  0xee   : > { %1116 = vadd.xlane.f32.xlu1 %v1115_v44 }
  0xef   : > { %1113 = vadd.xlane.f32.xlu0 %v1112_v51  ;;  %v950_v51 = vld [vmem:[#allocation3 + $0x90] sm:$0xff] }
  0xf2   : > { %1122 = vadd.xlane.f32.xlu1 %v1121_v52  ;;  %v953_v52 = vld [vmem:[#allocation3 + $0xa8] sm:$0xff] }
  0xf3   : > { %1119 = vadd.xlane.f32.xlu0 %v1118_v56 }
  0xf4   : > { %779 = vmatmul.mubr.bf16.gmra.mrb[20].mxu0 %v2195_v22  ;;  %843 = vmatmul.mubr.bf16.gmra.mrb[20].mxu1 %v2211_v28 }
  0xf5   : > { %786 = vmatprep.mubr.bf16.mxu0 %v2198_v29  ;;  %850 = vmatprep.mubr.bf16.mxu1 %v2214_v30 }
  0xfc   : > { %787 = vmatmul.mubr.bf16.gmra.mrb[24].mxu0 %v2197_v47  ;;  %851 = vmatmul.mubr.bf16.gmra.mrb[24].mxu1 %v2213_v48 }
  0xfd   : > { %794 = vmatprep.mubr.bf16.mxu0 %v2200_v49  ;;  %858 = vmatprep.mubr.bf16.mxu1 %v2216_v50 }
 0x104   : > { %795 = vmatmul.mubr.bf16.gmra.mrb[28].mxu0 %v2199_v12  ;;  %859 = vmatmul.mubr.bf16.gmra.mrb[28].mxu1 %v2215_v21  ;;  %v952_v21 = vld [vmem:[#allocation3 + $0xa0] sm:$0xff] }
 0x141   : > { %v1036_v57 = vpop.xlane.xlu1 %1035 }
 0x142   : > { %v1126_v58 = vadd.f32 %v1036_v57, %v934_v14  ;;  %v955_v14 = vld [vmem:[#allocation3 + $0xb8] sm:$0xff] }
 0x144   : > { %1159 = vst.msk [vmem:[#allocation3 + $0x10] sm:$0xff] %vm1156_vm2, %v1126_v58  ;;  %v1030_v41 = vpop.xlane.xlu0 %1029 }
 0x145   : > { %v1039_v53 = vpop.xlane.xlu1 %1038  ;;  %v1124_v60 = vadd.f32 %v1030_v41, %v932_v59  ;;  %v954_v41 = vld [vmem:[#allocation3 + $0xb0] sm:$0xff] }
 0x146   : > { %v1127_v1 = vadd.f32 %v1039_v53, %v935_v39  ;;  %v957_v53 = vld [vmem:[#allocation3 + $0xc8] sm:$0xff] }
 0x147   : > { %1157 = vst.msk [vmem:[#allocation3] sm:$0xff] %vm1156_vm2, %v1124_v60 }
 0x148   : > { %1160 = vst.msk [vmem:[#allocation3 + $0x18] sm:$0xff] %vm1156_vm2, %v1127_v1  ;;  %v1033_v24 = vpop.xlane.xlu0 %1032 }
 0x149   : > { %v1045_v37 = vpop.xlane.xlu1 %1044  ;;  %v1125_v4 = vadd.f32 %v1033_v24, %v933_v2  ;;  %v956_v24 = vld [vmem:[#allocation3 + $0xc0] sm:$0xff] }
 0x14a   : > { %v1129_v5 = vadd.f32 %v1045_v37, %v937_v3  ;;  %v959_v37 = vld [vmem:[#allocation3 + $0xd8] sm:$0xff] }
 0x14b   : > { %1158 = vst.msk [vmem:[#allocation3 + $0x8] sm:$0xff] %vm1156_vm2, %v1125_v4 }
 0x14c   : > { %1162 = vst.msk [vmem:[#allocation3 + $0x28] sm:$0xff] %vm1156_vm2, %v1129_v5  ;;  %v1042_v63 = vpop.xlane.xlu0 %1041 }
 0x14d   : > { %v1051_v7 = vpop.xlane.xlu1 %1050  ;;  %v1128_v8 = vadd.f32 %v1042_v63, %v936_v36  ;;  %v958_v63 = vld [vmem:[#allocation3 + $0xd0] sm:$0xff] }
 0x14e   : > { %v1131_v9 = vadd.f32 %v1051_v7, %v939_v6  ;;  %v961_v7 = vld [vmem:[#allocation3 + $0xe8] sm:$0xff] }
 0x14f   : > { %1161 = vst.msk [vmem:[#allocation3 + $0x20] sm:$0xff] %vm1156_vm2, %v1128_v8 }
 0x150   : > { %1164 = vst.msk [vmem:[#allocation3 + $0x38] sm:$0xff] %vm1156_vm2, %v1131_v9  ;;  %v1048_v13 = vpop.xlane.xlu0 %1047 }
 0x151   : > { %v1057_v15 = vpop.xlane.xlu1 %1056  ;;  %v1130_v17 = vadd.f32 %v1048_v13, %v938_v62  ;;  %v960_v13 = vld [vmem:[#allocation3 + $0xe0] sm:$0xff] }
 0x152   : > { %v1133_v18 = vadd.f32 %v1057_v15, %v941_v10  ;;  %v963_v15 = vld [vmem:[#allocation3 + $0xf8] sm:$0xff] }
 0x153   : > { %1163 = vst.msk [vmem:[#allocation3 + $0x30] sm:$0xff] %vm1156_vm2, %v1130_v17 }
 0x154   : > { %1166 = vst.msk [vmem:[#allocation3 + $0x48] sm:$0xff] %vm1156_vm2, %v1133_v18  ;;  %v1054_v19 = vpop.xlane.xlu0 %1053 }
 0x155   : > { %v1063_v20 = vpop.xlane.xlu1 %1062  ;;  %v1132_v23 = vadd.f32 %v1054_v19, %v940_v54  ;;  %v962_v19 = vld [vmem:[#allocation3 + $0xf0] sm:$0xff] }
 0x156   : > { %v1135_v25 = vadd.f32 %v1063_v20, %v943_v61 }
 0x157   : > { %1165 = vst.msk [vmem:[#allocation3 + $0x40] sm:$0xff] %vm1156_vm2, %v1132_v23 }
 0x158   : > { %1168 = vst.msk [vmem:[#allocation3 + $0x58] sm:$0xff] %vm1156_vm2, %v1135_v25  ;;  %v1060_v22 = vpop.xlane.xlu0 %1059 }
 0x159   : > { %v1134_v29 = vadd.f32 %v1060_v22, %v942_v26 }
 0x15b   : > { %v1069_v28 = vpop.xlane.xlu1 %1068  ;;  %1167 = vst.msk [vmem:[#allocation3 + $0x50] sm:$0xff] %vm1156_vm2, %v1134_v29 }
 0x15c   : > { %v1137_v30 = vadd.f32 %v1069_v28, %v945_v27  ;;  %v1066_v33 = vpop.xlane.xlu0 %1065  ;;  %v402_v27 = vld [vmem:[#allocation2 + $0x80] sm:$0xff] }
 0x15d   : > { %v1136_v38 = vadd.f32 %v1066_v33, %v944_v31  ;;  %v386_v28 = vld [vmem:[#allocation2] sm:$0xff] }
 0x15e   : > { %1170 = vst.msk [vmem:[#allocation3 + $0x68] sm:$0xff] %vm1156_vm2, %v1137_v30 }
 0x15f   : > { %v1075_v35 = vpop.xlane.xlu1 %1074  ;;  %1169 = vst.msk [vmem:[#allocation3 + $0x60] sm:$0xff] %vm1156_vm2, %v1136_v38 }
 0x160   : > { %v1139_v42 = vadd.f32 %v1075_v35, %v947_v32  ;;  %v1072_v43 = vpop.xlane.xlu0 %1071  ;;  %v387_v35 = vld [vmem:[#allocation2 + $0x8] sm:$0xff] }
 0x161   : > { %v1138_v40 = vadd.f32 %v1072_v43, %v946_v0 }
 0x162   : > { %1172 = vst.msk [vmem:[#allocation3 + $0x78] sm:$0xff] %vm1156_vm2, %v1139_v42  ;;  %v403_v42 = vld [vmem:[#allocation2 + $0x88] sm:$0xff] }
 0x163   : > { %v1081_v34 = vpop.xlane.xlu1 %1080  ;;  %1171 = vst.msk [vmem:[#allocation3 + $0x70] sm:$0xff] %vm1156_vm2, %v1138_v40 }
 0x164   : > { %v1141_v44 = vadd.f32 %v1081_v34, %v949_v11  ;;  %v1078_v47 = vpop.xlane.xlu0 %1077 }
 0x165   : > { %v1140_v49 = vadd.f32 %v1078_v47, %v948_v45 }
 0x166   : > { %1174 = vst.msk [vmem:[#allocation3 + $0x88] sm:$0xff] %vm1156_vm2, %v1141_v44 }
 0x167   : > { %v1087_v48 = vpop.xlane.xlu1 %1086  ;;  %1173 = vst.msk [vmem:[#allocation3 + $0x80] sm:$0xff] %vm1156_vm2, %v1140_v49 }
 0x168   : > { %v1143_v50 = vadd.f32 %v1087_v48, %v951_v46  ;;  %v1084_v16 = vpop.xlane.xlu0 %1083  ;;  %v404_v48 = vld [vmem:[#allocation2 + $0x90] sm:$0xff] }
 0x169   : > { %v1142_v56 = vadd.f32 %v1084_v16, %v950_v51 }
 0x16a   : > { %1176 = vst.msk [vmem:[#allocation3 + $0x98] sm:$0xff] %vm1156_vm2, %v1143_v50  ;;  %v388_v50 = vld [vmem:[#allocation2 + $0x10] sm:$0xff] }
 0x16b   : > { %v1093_v55 = vpop.xlane.xlu1 %1092  ;;  %1175 = vst.msk [vmem:[#allocation3 + $0x90] sm:$0xff] %vm1156_vm2, %v1142_v56 }
 0x16c   : > { %v1145_v12 = vadd.f32 %v1093_v55, %v953_v52  ;;  %v1090_v57 = vpop.xlane.xlu0 %1089 }
 0x16d   : > { %v1144_v59 = vadd.f32 %v1090_v57, %v952_v21 }
 0x16e   : > { %1178 = vst.msk [vmem:[#allocation3 + $0xa8] sm:$0xff] %vm1156_vm2, %v1145_v12  ;;  %v389_v12 = vld [vmem:[#allocation2 + $0x18] sm:$0xff] }
 0x16f   : > { %v1099_v58 = vpop.xlane.xlu1 %1098  ;;  %1177 = vst.msk [vmem:[#allocation3 + $0xa0] sm:$0xff] %vm1156_vm2, %v1144_v59 }
 0x170   : > { %v1147_v39 = vadd.f32 %v1099_v58, %v955_v14  ;;  %v1096_v60 = vpop.xlane.xlu0 %1095  ;;  %v405_v14 = vld [vmem:[#allocation2 + $0x98] sm:$0xff] }
 0x171   : > { %v1146_v2 = vadd.f32 %v1096_v60, %v954_v41 }
 0x172   : > { %1180 = vst.msk [vmem:[#allocation3 + $0xb8] sm:$0xff] %vm1156_vm2, %v1147_v39 }
 0x173   : > { %v1105_v1 = vpop.xlane.xlu1 %1104  ;;  %1179 = vst.msk [vmem:[#allocation3 + $0xb0] sm:$0xff] %vm1156_vm2, %v1146_v2 }
 0x174   : > { %v1149_v3 = vadd.f32 %v1105_v1, %v957_v53  ;;  %v1102_v4 = vpop.xlane.xlu0 %1101 }
 0x175   : > { %v1148_v36 = vadd.f32 %v1102_v4, %v956_v24 }
 0x176   : > { %1182 = vst.msk [vmem:[#allocation3 + $0xc8] sm:$0xff] %vm1156_vm2, %v1149_v3  ;;  %v406_v3 = vld [vmem:[#allocation2 + $0xa0] sm:$0xff] }
 0x177   : > { %v1111_v5 = vpop.xlane.xlu1 %1110  ;;  %1181 = vst.msk [vmem:[#allocation3 + $0xc0] sm:$0xff] %vm1156_vm2, %v1148_v36 }
 0x178   : > { %v1151_v6 = vadd.f32 %v1111_v5, %v959_v37  ;;  %v1108_v8 = vpop.xlane.xlu0 %1107  ;;  %v390_v37 = vld [vmem:[#allocation2 + $0x20] sm:$0xff] }
 0x179   : > { %v1150_v62 = vadd.f32 %v1108_v8, %v958_v63 }
 0x17a   : > { %1184 = vst.msk [vmem:[#allocation3 + $0xd8] sm:$0xff] %vm1156_vm2, %v1151_v6 }
 0x17b   : > { %v1117_v9 = vpop.xlane.xlu1 %1116  ;;  %1183 = vst.msk [vmem:[#allocation3 + $0xd0] sm:$0xff] %vm1156_vm2, %v1150_v62 }
 0x17c   : > { %v1153_v10 = vadd.f32 %v1117_v9, %v961_v7  ;;  %v1114_v17 = vpop.xlane.xlu0 %1113  ;;  %v391_v7 = vld [vmem:[#allocation2 + $0x28] sm:$0xff] }
 0x17d   : > { %v1152_v54 = vadd.f32 %v1114_v17, %v960_v13  ;;  %v407_v9 = vld [vmem:[#allocation2 + $0xa8] sm:$0xff] }
 0x17e   : > { %1186 = vst.msk [vmem:[#allocation3 + $0xe8] sm:$0xff] %vm1156_vm2, %v1153_v10 }
 0x17f   : > { %v1123_v18 = vpop.xlane.xlu1 %1122  ;;  %1185 = vst.msk [vmem:[#allocation3 + $0xe0] sm:$0xff] %vm1156_vm2, %v1152_v54 }
 0x180   : > { %v1155_v61 = vadd.f32 %v1123_v18, %v963_v15  ;;  %v1120_v20 = vpop.xlane.xlu0 %1119 }
 0x181   : > { %v1154_v23 = vadd.f32 %v1120_v20, %v962_v19  ;;  %v408_v20 = vld [vmem:[#allocation2 + $0xb0] sm:$0xff] }
 0x182   : > { %1188 = vst.msk [vmem:[#allocation3 + $0xf8] sm:$0xff] %vm1156_vm2, %v1155_v61 }
 0x183   : > { %1187 = vst.msk [vmem:[#allocation3 + $0xf0] sm:$0xff] %vm1156_vm2, %v1154_v23 }
 0x19f   : > { %v2448_v25 = vpop.f32.mrb[0].mxu0  ;;  %v2496_v26 = vpop.f32.mrb[0].mxu1 }
 0x1a0   : > { %v2497_v22 = vpop.f32.mrb[1].mxu1  ;;  %v2449_v29 = vpop.f32.mrb[1].mxu0 }
 0x1a1   : > { %v2498_v30 = vadd.f32 %v2497_v22, %v2496_v26  ;;  %v2450_v31 = vadd.f32 %v2449_v29, %v2448_v25  ;;  %v2451_v32 = vpop.f32.mrb[2].mxu0  ;;  %v2499_v33 = vpop.f32.mrb[2].mxu1  ;;  %v392_v25 = vld [vmem:[#allocation2 + $0x30] sm:$0xff] }
 0x1a2   : > { %v2452_v38 = vpop.f32.mrb[3].mxu0  ;;  %v2500_v0 = vpop.f32.mrb[3].mxu1 }
 0x1a3   : > { %v883_v11 = vadd.f32 %v2498_v30, %v402_v27  ;;  %v867_v43 = vadd.f32 %v2450_v31, %v386_v28  ;;  %v2453_v34 = vadd.f32 %v2452_v38, %v2451_v32  ;;  %v2501_v40 = vadd.f32 %v2500_v0, %v2499_v33  ;;  %v393_v30 = vld [vmem:[#allocation2 + $0x38] sm:$0xff] }
 0x1a4   : > { %v409_v32 = vld [vmem:[#allocation2 + $0xb8] sm:$0xff] }
 0x1a5   : > { %916 = vst.msk [vmem:[#allocation2 + $0x80] sm:$0xff] %vm899_vm3, %v883_v11  ;;  %900 = vst.msk [vmem:[#allocation2] sm:$0xff] %vm899_vm3, %v867_v43  ;;  %v868_v44 = vadd.f32 %v2453_v34, %v387_v35  ;;  %v884_v45 = vadd.f32 %v2501_v40, %v403_v42 }
 0x1a7   : > { %901 = vst.msk [vmem:[#allocation2 + $0x8] sm:$0xff] %vm899_vm3, %v868_v44  ;;  %917 = vst.msk [vmem:[#allocation2 + $0x88] sm:$0xff] %vm899_vm3, %v884_v45  ;;  %v2454_v46 = vpop.f32.mrb[4].mxu0  ;;  %v2502_v47 = vpop.f32.mrb[4].mxu1  ;;  %v410_v44 = vld [vmem:[#allocation2 + $0xc0] sm:$0xff] }
 0x1a8   : > { %v2503_v49 = vpop.f32.mrb[5].mxu1  ;;  %v2455_v51 = vpop.f32.mrb[5].mxu0 }
 0x1a9   : > { %v2504_v52 = vadd.f32 %v2503_v49, %v2502_v47  ;;  %v2456_v16 = vadd.f32 %v2455_v51, %v2454_v46  ;;  %v2457_v55 = vpop.f32.mrb[6].mxu0  ;;  %v2505_v56 = vpop.f32.mrb[6].mxu1  ;;  %v394_v46 = vld [vmem:[#allocation2 + $0x40] sm:$0xff] }
 0x1aa   : > { %v2458_v21 = vpop.f32.mrb[7].mxu0  ;;  %v2506_v57 = vpop.f32.mrb[7].mxu1 }
 0x1ab   : > { %v885_v58 = vadd.f32 %v2504_v52, %v404_v48  ;;  %v869_v59 = vadd.f32 %v2456_v16, %v388_v50  ;;  %v2459_v39 = vadd.f32 %v2458_v21, %v2457_v55  ;;  %v2507_v41 = vadd.f32 %v2506_v57, %v2505_v56  ;;  %v395_v52 = vld [vmem:[#allocation2 + $0x48] sm:$0xff] }
 0x1ac   : > { %v411_v55 = vld [vmem:[#allocation2 + $0xc8] sm:$0xff] }
 0x1ad   : > { %918 = vst.msk [vmem:[#allocation2 + $0x90] sm:$0xff] %vm899_vm3, %v885_v58  ;;  %902 = vst.msk [vmem:[#allocation2 + $0x10] sm:$0xff] %vm899_vm3, %v869_v59  ;;  %v870_v53 = vadd.f32 %v2459_v39, %v389_v12  ;;  %v886_v60 = vadd.f32 %v2507_v41, %v405_v14 }
 0x1af   : > { %903 = vst.msk [vmem:[#allocation2 + $0x18] sm:$0xff] %vm899_vm3, %v870_v53  ;;  %919 = vst.msk [vmem:[#allocation2 + $0x98] sm:$0xff] %vm899_vm3, %v886_v60  ;;  %v2460_v1 = vpop.f32.mrb[8].mxu0  ;;  %v2508_v2 = vpop.f32.mrb[8].mxu1  ;;  %v412_v53 = vld [vmem:[#allocation2 + $0xd0] sm:$0xff] }
 0x1b0   : > { %v2509_v24 = vpop.f32.mrb[9].mxu1  ;;  %v2461_v4 = vpop.f32.mrb[9].mxu0 }
 0x1b1   : > { %v2510_v5 = vadd.f32 %v2509_v24, %v2508_v2  ;;  %v2462_v36 = vadd.f32 %v2461_v4, %v2460_v1  ;;  %v2463_v6 = vpop.f32.mrb[10].mxu0  ;;  %v2511_v63 = vpop.f32.mrb[10].mxu1  ;;  %v396_v1 = vld [vmem:[#allocation2 + $0x50] sm:$0xff] }
 0x1b2   : > { %v2464_v8 = vpop.f32.mrb[11].mxu0  ;;  %v2512_v62 = vpop.f32.mrb[11].mxu1 }
 0x1b3   : > { %v887_v10 = vadd.f32 %v2510_v5, %v406_v3  ;;  %v871_v13 = vadd.f32 %v2462_v36, %v390_v37  ;;  %v2465_v15 = vadd.f32 %v2464_v8, %v2463_v6  ;;  %v2513_v17 = vadd.f32 %v2512_v62, %v2511_v63  ;;  %v397_v5 = vld [vmem:[#allocation2 + $0x58] sm:$0xff] }
 0x1b4   : > { %v413_v6 = vld [vmem:[#allocation2 + $0xd8] sm:$0xff] }
 0x1b5   : > { %920 = vst.msk [vmem:[#allocation2 + $0xa0] sm:$0xff] %vm899_vm3, %v887_v10  ;;  %904 = vst.msk [vmem:[#allocation2 + $0x20] sm:$0xff] %vm899_vm3, %v871_v13  ;;  %v872_v18 = vadd.f32 %v2465_v15, %v391_v7  ;;  %v888_v54 = vadd.f32 %v2513_v17, %v407_v9 }
 0x1b7   : > { %905 = vst.msk [vmem:[#allocation2 + $0x28] sm:$0xff] %vm899_vm3, %v872_v18  ;;  %921 = vst.msk [vmem:[#allocation2 + $0xa8] sm:$0xff] %vm899_vm3, %v888_v54  ;;  %v2466_v61 = vpop.f32.mrb[12].mxu0  ;;  %v2514_v19 = vpop.f32.mrb[12].mxu1  ;;  %v414_v18 = vld [vmem:[#allocation2 + $0xe0] sm:$0xff] }
 0x1b8   : > { %v2515_v23 = vpop.f32.mrb[13].mxu1  ;;  %v2467_v26 = vpop.f32.mrb[13].mxu0 }
 0x1b9   : > { %v2516_v27 = vadd.f32 %v2515_v23, %v2514_v19  ;;  %v2468_v22 = vadd.f32 %v2467_v26, %v2466_v61  ;;  %v2469_v28 = vpop.f32.mrb[14].mxu0  ;;  %v2517_v29 = vpop.f32.mrb[14].mxu1  ;;  %v398_v61 = vld [vmem:[#allocation2 + $0x60] sm:$0xff] }
 0x1ba   : > { %v2470_v31 = vpop.f32.mrb[15].mxu0  ;;  %v2518_v33 = vpop.f32.mrb[15].mxu1 }
 0x1bb   : > { %v889_v35 = vadd.f32 %v2516_v27, %v408_v20  ;;  %v873_v38 = vadd.f32 %v2468_v22, %v392_v25  ;;  %v2471_v42 = vadd.f32 %v2470_v31, %v2469_v28  ;;  %v2519_v0 = vadd.f32 %v2518_v33, %v2517_v29  ;;  %v399_v27 = vld [vmem:[#allocation2 + $0x68] sm:$0xff] }
 0x1bc   : > { %v415_v28 = vld [vmem:[#allocation2 + $0xe8] sm:$0xff] }
 0x1bd   : > { %922 = vst.msk [vmem:[#allocation2 + $0xb0] sm:$0xff] %vm899_vm3, %v889_v35  ;;  %906 = vst.msk [vmem:[#allocation2 + $0x30] sm:$0xff] %vm899_vm3, %v873_v38  ;;  %v874_v11 = vadd.f32 %v2471_v42, %v393_v30  ;;  %v890_v43 = vadd.f32 %v2519_v0, %v409_v32 }
 0x1bf   : > { %907 = vst.msk [vmem:[#allocation2 + $0x38] sm:$0xff] %vm899_vm3, %v874_v11  ;;  %923 = vst.msk [vmem:[#allocation2 + $0xb8] sm:$0xff] %vm899_vm3, %v890_v43  ;;  %v2472_v34 = vpop.f32.mrb[16].mxu0  ;;  %v2520_v40 = vpop.f32.mrb[16].mxu1  ;;  %v416_v11 = vld [vmem:[#allocation2 + $0xf0] sm:$0xff] }
 0x1c0   : > { %v2521_v45 = vpop.f32.mrb[17].mxu1  ;;  %v2473_v47 = vpop.f32.mrb[17].mxu0 }
 0x1c1   : > { %v2522_v48 = vadd.f32 %v2521_v45, %v2520_v40  ;;  %v2474_v49 = vadd.f32 %v2473_v47, %v2472_v34  ;;  %v2475_v50 = vpop.f32.mrb[18].mxu0  ;;  %v2523_v51 = vpop.f32.mrb[18].mxu1  ;;  %v400_v34 = vld [vmem:[#allocation2 + $0x70] sm:$0xff] }
 0x1c2   : > { %v2476_v16 = vpop.f32.mrb[19].mxu0  ;;  %v2524_v56 = vpop.f32.mrb[19].mxu1 }
 0x1c3   : > { %v891_v12 = vadd.f32 %v2522_v48, %v410_v44  ;;  %v875_v21 = vadd.f32 %v2474_v49, %v394_v46  ;;  %v2477_v14 = vadd.f32 %v2476_v16, %v2475_v50  ;;  %v2525_v57 = vadd.f32 %v2524_v56, %v2523_v51  ;;  %v401_v48 = vld [vmem:[#allocation2 + $0x78] sm:$0xff] }
 0x1c4   : > { %v417_v50 = vld [vmem:[#allocation2 + $0xf8] sm:$0xff] }
 0x1c5   : > { %924 = vst.msk [vmem:[#allocation2 + $0xc0] sm:$0xff] %vm899_vm3, %v891_v12  ;;  %908 = vst.msk [vmem:[#allocation2 + $0x40] sm:$0xff] %vm899_vm3, %v875_v21  ;;  %v876_v58 = vadd.f32 %v2477_v14, %v395_v52  ;;  %v892_v59 = vadd.f32 %v2525_v57, %v411_v55  ;;  %v1194_v14 = vld [vmem:[#allocation3 + $0x8] sm:$0xff] (!%p2233_p2)  ;;  %v1193_v57 = vld [vmem:[#allocation3] sm:$0xff] (!%p2233_p2) }
 0x1c7   : > { %909 = vst.msk [vmem:[#allocation2 + $0x48] sm:$0xff] %vm899_vm3, %v876_v58  ;;  %925 = vst.msk [vmem:[#allocation2 + $0xc8] sm:$0xff] %vm899_vm3, %v892_v59  ;;  %v2478_v39 = vpop.f32.mrb[20].mxu0  ;;  %v2526_v41 = vpop.f32.mrb[20].mxu1  ;;  %v1210_v58 = vld [vmem:[#allocation3 + $0x88] sm:$0xff] (!%p2233_p2)  ;;  %v3111_v59 = vmov (!%p2233_p2), 0  }
 0x1c8   : > { %v2527_v60 = vpop.f32.mrb[21].mxu1  ;;  %v2479_v2 = vpop.f32.mrb[21].mxu0  ;;  %2825 = vset.pattern.permute.xlu1 (!%p2233_p2), %v3111_v59  ;;  %2824 = vset.pattern.permute.xlu0 (!%p2233_p2), %v3111_v59 }
 0x1c9   : > { %v2528_v3 = vadd.f32 %v2527_v60, %v2526_v41  ;;  %v2480_v24 = vadd.f32 %v2479_v2, %v2478_v39  ;;  %v2481_v37 = vpop.f32.mrb[22].mxu0  ;;  %v2529_v4 = vpop.f32.mrb[22].mxu1  ;;  %v1226_v39 = vmax.f32 (!%p2233_p2), %v1194_v14, 1.0  ;;  %v1225_v41 = vmax.f32 (!%p2233_p2), %v1193_v57, 1.0  ;;  %v1209_v60 = vld [vmem:[#allocation3 + $0x80] sm:$0xff] (!%p2233_p2)  ;;  %v1211_v2 = vld [vmem:[#allocation3 + $0x90] sm:$0xff] (!%p2233_p2) }
 0x1ca   : > { %v2482_v36 = vpop.f32.mrb[23].mxu0  ;;  %v2530_v63 = vpop.f32.mrb[23].mxu1 }
 0x1cb   : > { %v893_v7 = vadd.f32 %v2528_v3, %v412_v53  ;;  %v877_v8 = vadd.f32 %v2480_v24, %v396_v1  ;;  %v2483_v9 = vadd.f32 %v2482_v36, %v2481_v37  ;;  %v2531_v62 = vadd.f32 %v2530_v63, %v2529_v4  ;;  %v1195_v3 = vld [vmem:[#allocation3 + $0x10] sm:$0xff] (!%p2233_p2)  ;;  %v1212_v4 = vld [vmem:[#allocation3 + $0x98] sm:$0xff] (!%p2233_p2)  ;;  %v1213_v63 = vld [vmem:[#allocation3 + $0xa0] sm:$0xff] (!%p2233_p2) }
 0x1cc   : > { %v1242_v53 = vmax.f32 (!%p2233_p2), %v1210_v58, 1.0  ;;  %v1241_v1 = vmax.f32 (!%p2233_p2), %v1209_v60, 1.0  ;;  %2826 = vrcp.f32 (!%p2233_p2), %v1226_v39  ;;  %v1243_v24 = vmax.f32 (!%p2233_p2), %v1211_v2, 1.0  ;;  %v1221_v58 = vld [vmem:[#allocation3 + $0xe0] sm:$0xff] (!%p2233_p2) }
 0x1cd   : > { %926 = vst.msk [vmem:[#allocation2 + $0xd0] sm:$0xff] %vm899_vm3, %v893_v7  ;;  %910 = vst.msk [vmem:[#allocation2 + $0x50] sm:$0xff] %vm899_vm3, %v877_v8  ;;  %v878_v10 = vadd.f32 %v2483_v9, %v397_v5  ;;  %v894_v13 = vadd.f32 %v2531_v62, %v413_v6  ;;  %2828 = vrcp.f32 (!%p2233_p2), %v1225_v41  ;;  %v1227_v37 = vmax.f32 (!%p2233_p2), %v1195_v3, 1.0  ;;  %v1196_v5 = vld [vmem:[#allocation3 + $0x18] sm:$0xff] (!%p2233_p2)  ;;  %v1197_v7 = vld [vmem:[#allocation3 + $0x20] sm:$0xff] (!%p2233_p2) }
 0x1ce   : > { %2830 = vrcp.f32 (!%p2233_p2), %v1242_v53  ;;  %v1244_v36 = vmax.f32 (!%p2233_p2), %v1212_v4, 1.0  ;;  %v1228_v6 = vmax.f32 (!%p2233_p2), %v1196_v5, 1.0  ;;  %v1245_v9 = vmax.f32 (!%p2233_p2), %v1213_v63, 1.0  ;;  %v1205_v39 = vld [vmem:[#allocation3 + $0x60] sm:$0xff] (!%p2233_p2)  ;;  %v1206_v3 = vld [vmem:[#allocation3 + $0x68] sm:$0xff] (!%p2233_p2)  ;;  %v1223_v5 = vld [vmem:[#allocation3 + $0xf0] sm:$0xff] (!%p2233_p2) }
 0x1cf   : > { %911 = vst.msk [vmem:[#allocation2 + $0x58] sm:$0xff] %vm899_vm3, %v878_v10  ;;  %927 = vst.msk [vmem:[#allocation2 + $0xd8] sm:$0xff] %vm899_vm3, %v894_v13  ;;  %v2484_v15 = vpop.f32.mrb[24].mxu0  ;;  %v2532_v17 = vpop.f32.mrb[24].mxu1  ;;  %2832 = vrcp.f32 (!%p2233_p2), %v1241_v1  ;;  %v1229_v10 = vmax.f32 (!%p2233_p2), %v1197_v7, 1.0  ;;  %v1214_v13 = vld [vmem:[#allocation3 + $0xa8] sm:$0xff] (!%p2233_p2) }
 0x1d0   : > { %v2533_v54 = vpop.f32.mrb[25].mxu1  ;;  %v2485_v19 = vpop.f32.mrb[25].mxu0  ;;  %2834 = vrcp.f32 (!%p2233_p2), %v1243_v24  ;;  %v1253_v53 = vmax.f32 (!%p2233_p2), %v1221_v58, 1.0  ;;  %v1237_v60 = vmax.f32 (!%p2233_p2), %v1205_v39, 1.0  ;;  %v1222_v1 = vld [vmem:[#allocation3 + $0xe8] sm:$0xff] (!%p2233_p2)  ;;  %v1238_v4 = vmax.f32 (!%p2233_p2), %v1206_v3, 1.0 }
 0x1d1   : > { %v2534_v20 = vadd.f32 %v2533_v54, %v2532_v17  ;;  %v2486_v23 = vadd.f32 %v2485_v19, %v2484_v15  ;;  %v2487_v25 = vpop.f32.mrb[26].mxu0  ;;  %v2535_v26 = vpop.f32.mrb[26].mxu1  ;;  %2836 = vrcp.f32 (!%p2233_p2), %v1227_v37  ;;  %v1513_v15 = vld [vmem:[#allocation7] sm:$0xff] (!%p2233_p2)  ;;  %v1254_v37 = vmax.f32 (!%p2233_p2), %v1222_v1, 1.0 }
 0x1d2   : > { %v2488_v22 = vpop.f32.mrb[27].mxu0  ;;  %v2536_v29 = vpop.f32.mrb[27].mxu1  ;;  %2838 = vrcp.f32 (!%p2233_p2), %v1244_v36  ;;  %2577 = vmatprep.subr.mxu0 (!%p2233_p2), %v1513_v15  ;;  %2643 = vmatprep.subr.mxu1 (!%p2233_p2), %v1513_v15  ;;  %v1255_v7 = vmax.f32 (!%p2233_p2), %v1223_v5, 1.0 }
 0x1d3   : > { %v895_v30 = vadd.f32 %v2534_v20, %v414_v18  ;;  %v879_v31 = vadd.f32 %v2486_v23, %v398_v61  ;;  %v2489_v32 = vadd.f32 %v2488_v22, %v2487_v25  ;;  %v2537_v33 = vadd.f32 %v2536_v29, %v2535_v26  ;;  %v1198_v18 = vld [vmem:[#allocation3 + $0x28] sm:$0xff] (!%p2233_p2)  ;;  %2578 = vmatpush3.msra.mxu0 (!%p2233_p2), %v1513_v15  ;;  %v1215_v20 = vld [vmem:[#allocation3 + $0xb0] sm:$0xff] (!%p2233_p2) }
 0x1d4   : > { %2840 = vrcp.f32 (!%p2233_p2), %v1228_v6  ;;  %v1246_v61 = vmax.f32 (!%p2233_p2), %v1214_v13, 1.0  ;;  %2644 = vmatpush3.msra.mxu1 (!%p2233_p2), %v1513_v15  ;;  %v1230_v19 = vmax.f32 (!%p2233_p2), %v1198_v18, 1.0  ;;  %v1199_v25 = vld [vmem:[#allocation3 + $0x30] sm:$0xff] (!%p2233_p2) }
 0x1d5   : > { %928 = vst.msk [vmem:[#allocation2 + $0xe0] sm:$0xff] %vm899_vm3, %v895_v30  ;;  %912 = vst.msk [vmem:[#allocation2 + $0x60] sm:$0xff] %vm899_vm3, %v879_v31  ;;  %v880_v35 = vadd.f32 %v2489_v32, %v399_v27  ;;  %v896_v38 = vadd.f32 %v2537_v33, %v415_v28  ;;  %2842 = vrcp.f32 (!%p2233_p2), %v1245_v9  ;;  %v1247_v27 = vmax.f32 (!%p2233_p2), %v1215_v20, 1.0  ;;  %v1216_v28 = vld [vmem:[#allocation3 + $0xb8] sm:$0xff] (!%p2233_p2)  ;;  %v1207_v6 = vld [vmem:[#allocation3 + $0x70] sm:$0xff] (!%p2233_p2) }
 0x1d6   : > { %v2827_v8 = vpop.eup (!%p2233_p2), %2826  ;;  %2844 = vrcp.f32 (!%p2233_p2), %v1229_v10  ;;  %v1231_v22 = vmax.f32 (!%p2233_p2), %v1199_v25, 1.0  ;;  %v1200_v30 = vld [vmem:[#allocation3 + $0x38] sm:$0xff] (!%p2233_p2)  ;;  %v1248_v32 = vmax.f32 (!%p2233_p2), %v1216_v28, 1.0 }
 0x1d7   : > { %913 = vst.msk [vmem:[#allocation2 + $0x68] sm:$0xff] %vm899_vm3, %v880_v35  ;;  %929 = vst.msk [vmem:[#allocation2 + $0xe8] sm:$0xff] %vm899_vm3, %v896_v38  ;;  %v2490_v42 = vpop.f32.mrb[28].mxu0  ;;  %v2538_v0 = vpop.f32.mrb[28].mxu1  ;;  %1328 = vperm.xlu1 (!%p2233_p2), %2825, %v2827_v8   ;;  %2846 = vrcp.f32 (!%p2233_p2), %v1246_v61  ;;  %v1232_v33 = vmax.f32 (!%p2233_p2), %v1200_v30, 1.0  ;;  %v1217_v35 = vld [vmem:[#allocation3 + $0xc0] sm:$0xff] (!%p2233_p2) }
 0x1d8   : > { %v2539_v43 = vpop.f32.mrb[29].mxu1  ;;  %v2491_v40 = vpop.f32.mrb[29].mxu0  ;;  %2848 = vrcp.f32 (!%p2233_p2), %v1230_v19  ;;  %v1239_v8 = vmax.f32 (!%p2233_p2), %v1207_v6, 1.0  ;;  %v1224_v9 = vld [vmem:[#allocation3 + $0xf8] sm:$0xff] (!%p2233_p2) }
 0x1d9   : > { %v2540_v44 = vadd.f32 %v2539_v43, %v2538_v0  ;;  %v2492_v45 = vadd.f32 %v2491_v40, %v2490_v42  ;;  %v2493_v46 = vpop.f32.mrb[30].mxu0  ;;  %v2541_v47 = vpop.f32.mrb[30].mxu1  ;;  %1192 = sbr.rel (%p2233_p2) target bundleno = 886 (0x376), region = 56  ;;  %2850 = vrcp.f32 (!%p2233_p2), %v1247_v27  ;;  %v1201_v42 = vld [vmem:[#allocation3 + $0x40] sm:$0xff] (!%p2233_p2)  ;;  %v1208_v10 = vld [vmem:[#allocation3 + $0x78] sm:$0xff] (!%p2233_p2)  ;;  %v1256_v15 = vmax.f32 (!%p2233_p2), %v1224_v9, 1.0 }
 0x1da   : > { %v2494_v49 = vpop.f32.mrb[31].mxu0  ;;  %v2542_v51 = vpop.f32.mrb[31].mxu1  ;;  %2852 = vrcp.f32 (!%p2233_p2), %v1231_v22  ;;  %v1233_v43 = vmax.f32 (!%p2233_p2), %v1201_v42, 1.0  ;;  %v1290_v27 = vld [vmem:[#allocation2 + $0x8] sm:$0xff] (!%p2233_p2)  ;;  %v1289_v22 = vld [vmem:[#allocation2] sm:$0xff] (!%p2233_p2) }
 0x1db   : > { %v897_v52 = vadd.f32 %v2540_v44, %v416_v11  ;;  %v881_v16 = vadd.f32 %v2492_v45, %v400_v34  ;;  %v2495_v55 = vadd.f32 %v2494_v49, %v2493_v46  ;;  %v2543_v56 = vadd.f32 %v2542_v51, %v2541_v47  ;;  %v2829_v62 = vpop.eup (!%p2233_p2), %2828  ;;  %v1218_v34 = vld [vmem:[#allocation3 + $0xc8] sm:$0xff] (!%p2233_p2) }
 0x1dc   : > { %v2831_v17 = vpop.eup (!%p2233_p2), %2830  ;;  %1323 = vperm.xlu0 (!%p2233_p2), %2824, %v2829_v62   ;;  %2854 = vrcp.f32 (!%p2233_p2), %v1248_v32  ;;  %v1249_v11 = vmax.f32 (!%p2233_p2), %v1217_v35, 1.0  ;;  %v1202_v44 = vld [vmem:[#allocation3 + $0x48] sm:$0xff] (!%p2233_p2)  ;;  %v1250_v46 = vmax.f32 (!%p2233_p2), %v1218_v34, 1.0 }
 0x1dd   : > { %930 = vst.msk [vmem:[#allocation2 + $0xf0] sm:$0xff] %vm899_vm3, %v897_v52  ;;  %914 = vst.msk [vmem:[#allocation2 + $0x70] sm:$0xff] %vm899_vm3, %v881_v16  ;;  %v882_v12 = vadd.f32 %v2495_v55, %v401_v48  ;;  %v898_v21 = vadd.f32 %v2543_v56, %v417_v50  ;;  %v2833_v54 = vpop.eup (!%p2233_p2), %2832  ;;  %1408 = vperm.xlu1 (!%p2233_p2), %2825, %v2831_v17   ;;  %2856 = vrcp.f32 (!%p2233_p2), %v1232_v33  ;;  %v1234_v47 = vmax.f32 (!%p2233_p2), %v1202_v44, 1.0  ;;  %v1219_v48 = vld [vmem:[#allocation3 + $0xd0] sm:$0xff] (!%p2233_p2)  ;;  %v1220_v55 = vld [vmem:[#allocation3 + $0xd8] sm:$0xff] (!%p2233_p2) }
 0x1de   : > { %v2835_v23 = vpop.eup (!%p2233_p2), %2834  ;;  %2858 = vrcp.f32 (!%p2233_p2), %v1249_v11  ;;  %v1203_v50 = vld [vmem:[#allocation3 + $0x50] sm:$0xff] (!%p2233_p2)  ;;  %v1251_v52 = vmax.f32 (!%p2233_p2), %v1219_v48, 1.0  ;;  %v1252_v14 = vmax.f32 (!%p2233_p2), %v1220_v55, 1.0  ;;  %v1240_v17 = vmax.f32 (!%p2233_p2), %v1208_v10, 1.0  ;;  %v1306_v32 = vld [vmem:[#allocation2 + $0x88] sm:$0xff] (!%p2233_p2)  ;;  %v1305_v33 = vld [vmem:[#allocation2 + $0x80] sm:$0xff] (!%p2233_p2) }
 0x1df   : > { %915 = vst.msk [vmem:[#allocation2 + $0x78] sm:$0xff] %vm899_vm3, %v882_v12  ;;  %931 = vst.msk [vmem:[#allocation2 + $0xf8] sm:$0xff] %vm899_vm3, %v898_v21  ;;  %v2837_v26 = vpop.eup (!%p2233_p2), %2836  ;;  %2860 = vrcp.f32 (!%p2233_p2), %v1233_v43  ;;  %v1235_v16 = vmax.f32 (!%p2233_p2), %v1203_v50, 1.0  ;;  %v1204_v12 = vld [vmem:[#allocation3 + $0x58] sm:$0xff] (!%p2233_p2)  ;;  %v1307_v11 = vld [vmem:[#allocation2 + $0x90] sm:$0xff] (!%p2233_p2) }
 0x1e0   : > { %1403 = vperm.xlu0 %2824, %v2833_v54   ;;  %v2839_v29 = vpop.eup %2838  ;;  %2862 = vrcp.f32 %v1250_v46  ;;  %v1236_v57 = vmax.f32 %v1204_v12, 1.0  ;;  %v1291_v43 = vld [vmem:[#allocation2 + $0x10] sm:$0xff]  ;;  %v1308_v46 = vld [vmem:[#allocation2 + $0x98] sm:$0xff] }
 0x1e1   : > { %1413 = vperm.xlu1 %2825, %v2835_v23   ;;  %v2841_v31 = vpop.eup %2840  ;;  %2864 = vrcp.f32 %v1234_v47  ;;  %v1292_v47 = vld [vmem:[#allocation2 + $0x18] sm:$0xff] }
 0x1e2   : > { %v2843_v38 = vpop.eup %2842  ;;  %2866 = vrcp.f32 %v1251_v52  ;;  %v1309_v52 = vld [vmem:[#allocation2 + $0xa0] sm:$0xff] }
 0x1e3   : > { %v2845_v0 = vpop.eup %2844  ;;  %2868 = vrcp.f32 %v1235_v16  ;;  %v1293_v16 = vld [vmem:[#allocation2 + $0x20] sm:$0xff] }
 0x1e4   : > { %1333 = vperm.xlu0 %2824, %v2837_v26   ;;  %v2847_v40 = vpop.eup %2846  ;;  %2870 = vrcp.f32 %v1252_v14  ;;  %v1310_v14 = vld [vmem:[#allocation2 + $0xa8] sm:$0xff] }
 0x1e5   : > { %1418 = vperm.xlu1 %2825, %v2839_v29   ;;  %v2849_v45 = vpop.eup %2848  ;;  %2872 = vrcp.f32 %v1236_v57  ;;  %v1294_v57 = vld [vmem:[#allocation2 + $0x28] sm:$0xff] }
 0x1e6   : > { %v2851_v49 = vpop.eup %2850  ;;  %2874 = vrcp.f32 %v1253_v53  ;;  %v1311_v53 = vld [vmem:[#allocation2 + $0xb0] sm:$0xff] }
 0x1e7   : > { %v2853_v51 = vpop.eup %2852  ;;  %2876 = vrcp.f32 %v1237_v60  ;;  %v1295_v60 = vld [vmem:[#allocation2 + $0x30] sm:$0xff] }
 0x1e8   : > { %1338 = vperm.xlu0 %2824, %v2841_v31   ;;  %v2855_v56 = vpop.eup %2854  ;;  %2878 = vrcp.f32 %v1254_v37  ;;  %v1312_v37 = vld [vmem:[#allocation2 + $0xb8] sm:$0xff] }
 0x1e9   : > { %1423 = vperm.xlu1 %2825, %v2843_v38   ;;  %v2857_v21 = vpop.eup %2856  ;;  %2880 = vrcp.f32 %v1238_v4  ;;  %v1296_v4 = vld [vmem:[#allocation2 + $0x38] sm:$0xff] }
 0x1ea   : > { %v2859_v59 = vpop.eup %2858  ;;  %2882 = vrcp.f32 %v1255_v7  ;;  %v1313_v7 = vld [vmem:[#allocation2 + $0xc0] sm:$0xff] }
 0x1eb   : > { %v2861_v41 = vpop.eup %2860  ;;  %2884 = vrcp.f32 %v1239_v8  ;;  %v1297_v8 = vld [vmem:[#allocation2 + $0x40] sm:$0xff] }
 0x1ec   : > { %1343 = vperm.xlu0 %2824, %v2845_v0   ;;  %v2863_v2 = vpop.eup %2862  ;;  %2886 = vrcp.f32 %v1256_v15  ;;  %v1314_v15 = vld [vmem:[#allocation2 + $0xc8] sm:$0xff] }
 0x1ed   : > { %1428 = vperm.xlu1 %2825, %v2847_v40   ;;  %v2865_v24 = vpop.eup %2864  ;;  %2888 = vrcp.f32 %v1240_v17  ;;  %v1298_v17 = vld [vmem:[#allocation2 + $0x48] sm:$0xff] }
 0x1ee   : > { %v2867_v36 = vpop.eup %2866 }
 0x1ef   : > { %v2869_v63 = vpop.eup %2868 }
 0x1f0   : > { %1348 = vperm.xlu0 %2824, %v2849_v45   ;;  %v2871_v62 = vpop.eup %2870 }
 0x1f1   : > { %1433 = vperm.xlu1 %2825, %v2851_v49   ;;  %v2873_v13 = vpop.eup %2872 }
 0x1f2   : > { %v2875_v18 = vpop.eup %2874 }
 0x1f3   : > { %v2877_v54 = vpop.eup %2876 }
 0x1f4   : > { %1353 = vperm.xlu0 %2824, %v2853_v51   ;;  %v2879_v61 = vpop.eup %2878 }
 0x1f5   : > { %1438 = vperm.xlu1 %2825, %v2855_v56   ;;  %v2881_v19 = vpop.eup %2880 }
 0x1f6   : > { %v2883_v20 = vpop.eup %2882 }
 0x1f7   : > { %v2885_v23 = vpop.eup %2884 }
 0x1f8   : > { %1358 = vperm.xlu0 %2824, %v2857_v21   ;;  %v2887_v25 = vpop.eup %2886 }
 0x1f9   : > { %1443 = vperm.xlu1 %2825, %v2859_v59   ;;  %v2889_v26 = vpop.eup %2888 }
 0x1fc   : > { %1363 = vperm.xlu0 %2824, %v2861_v41  }
 0x1fd   : > { %1448 = vperm.xlu1 %2825, %v2863_v2  }
 0x200   : > { %1368 = vperm.xlu0 %2824, %v2865_v24  }
 0x201   : > { %1453 = vperm.xlu1 %2825, %v2867_v36  }
 0x204   : > { %1373 = vperm.xlu0 %2824, %v2869_v63  }
 0x205   : > { %1458 = vperm.xlu1 %2825, %v2871_v62  }
 0x208   : > { %1378 = vperm.xlu0 %2824, %v2873_v13  }
 0x209   : > { %1463 = vperm.xlu1 %2825, %v2875_v18  }
 0x20c   : > { %1383 = vperm.xlu0 %2824, %v2877_v54  }
 0x20d   : > { %1468 = vperm.xlu1 %2825, %v2879_v61  }
 0x210   : > { %1388 = vperm.xlu0 %2824, %v2881_v19  }
 0x211   : > { %1473 = vperm.xlu1 %2825, %v2883_v20   ;;  %v1315_v20 = vld [vmem:[#allocation2 + $0xd0] sm:$0xff] }
 0x214   : > { %1393 = vperm.xlu0 %2824, %v2885_v23   ;;  %v1299_v23 = vld [vmem:[#allocation2 + $0x50] sm:$0xff] }
 0x215   : > { %1478 = vperm.xlu1 %2825, %v2887_v25  }
 0x218   : > { %1398 = vperm.xlu0 %2824, %v2889_v26  }
 0x256   : > { %v1329_v28 = vpop.permute.xlu1 %1328 }
 0x257   : > { %v1482_v29 = vmul.f32 %v1329_v28, %v1290_v27  ;;  %v1316_v28 = vld [vmem:[#allocation2 + $0xd8] sm:$0xff] }
 0x25b   : > { %v1324_v30 = vpop.permute.xlu0 %1323 }
 0x25c   : > { %v1481_v31 = vmul.f32 %v1324_v30, %v1289_v22  ;;  %v1409_v35 = vpop.permute.xlu1 %1408 }
 0x25d   : > { %v1498_v38 = vmul.f32 %v1409_v35, %v1306_v32  ;;  %v1317_v35 = vld [vmem:[#allocation2 + $0xe0] sm:$0xff] }
 0x25e   : > { %2579 = vmatprep.mubr.msk.f32.mxu0 %vm899_vm3, %v1481_v31 }
 0x25f   : > { %2580 = vmatmul.mubr.msk.f32.vlgmr.msra.gmra.mrb[0].mxu0 %vm899_vm3, %v1482_v29  ;;  %v1404_v42 = vpop.permute.xlu0 %1403  ;;  %v1300_v29 = vld [vmem:[#allocation2 + $0x58] sm:$0xff] }
 0x260   : > { %v1497_v0 = vmul.f32 %v1404_v42, %v1305_v33  ;;  %v1414_v34 = vpop.permute.xlu1 %1413 }
 0x261   : > { %v1499_v40 = vmul.f32 %v1414_v34, %v1307_v11  ;;  %v1318_v34 = vld [vmem:[#allocation2 + $0xe8] sm:$0xff] }
 0x262   : > { %2603 = vmatprep.mubr.msk.f32.mxu1 %vm899_vm3, %v1497_v0 }
 0x263   : > { %2604 = vmatmul.mubr.msk.f32.vlgmr.msra.gmra.mrb[0].mxu1 %vm899_vm3, %v1498_v38  ;;  %v1334_v44 = vpop.permute.xlu0 %1333  ;;  %v1301_v38 = vld [vmem:[#allocation2 + $0x60] sm:$0xff] }
 0x264   : > { %v1483_v45 = vmul.f32 %v1334_v44, %v1291_v43  ;;  %2606 = vmatprep.mubr.msk.f32.mxu1 %vm899_vm3, %v1499_v40  ;;  %v1419_v48 = vpop.permute.xlu1 %1418  ;;  %v1302_v40 = vld [vmem:[#allocation2 + $0x68] sm:$0xff] }
 0x265   : > { %v1500_v49 = vmul.f32 %v1419_v48, %v1308_v46  ;;  %v1319_v48 = vld [vmem:[#allocation2 + $0xf0] sm:$0xff] }
 0x266   : > { %2582 = vmatprep.mubr.msk.f32.mxu0 %vm899_vm3, %v1483_v45 }
 0x267   : > { %v1339_v50 = vpop.permute.xlu0 %1338  ;;  %2607 = vmatmul.mubr.msk.f32.gmra.mrb[2].mxu1 %vm899_vm3, %v1500_v49  ;;  %v1303_v49 = vld [vmem:[#allocation2 + $0x70] sm:$0xff] }
 0x268   : > { %v1484_v51 = vmul.f32 %v1339_v50, %v1292_v47  ;;  %v1424_v55 = vpop.permute.xlu1 %1423 }
 0x269   : > { %v1501_v56 = vmul.f32 %v1424_v55, %v1309_v52  ;;  %v1320_v55 = vld [vmem:[#allocation2 + $0xf8] sm:$0xff] }
 0x26a   : > { %2583 = vmatmul.mubr.msk.f32.gmra.mrb[2].mxu0 %vm899_vm3, %v1484_v51 }
 0x26b   : > { %v1344_v12 = vpop.permute.xlu0 %1343  ;;  %2609 = vmatprep.mubr.msk.f32.mxu1 %vm899_vm3, %v1501_v56  ;;  %v1304_v56 = vld [vmem:[#allocation2 + $0x78] sm:$0xff] }
 0x26c   : > { %v1485_v21 = vmul.f32 %v1344_v12, %v1293_v16  ;;  %v1429_v58 = vpop.permute.xlu1 %1428 }
 0x26d   : > { %v1502_v59 = vmul.f32 %v1429_v58, %v1310_v14  ;;  %v3797_v58 = vld [vmem:[#allocation9] ss:$0 sm:$0xff] }
 0x26e   : > { %2585 = vmatprep.mubr.msk.f32.mxu0 %vm899_vm3, %v1485_v21 }
 0x26f   : > { %v1349_v39 = vpop.permute.xlu0 %1348  ;;  %2610 = vmatmul.mubr.msk.f32.gmra.mrb[4].mxu1 %vm899_vm3, %v1502_v59 }
 0x270   : > { %v1486_v41 = vmul.f32 %v1349_v39, %v1294_v57  ;;  %v1434_v1 = vpop.permute.xlu1 %1433 }
 0x271   : > { %v1503_v2 = vmul.f32 %v1434_v1, %v1311_v53 }
 0x272   : > { %2586 = vmatmul.mubr.msk.f32.gmra.mrb[4].mxu0 %vm899_vm3, %v1486_v41 }
 0x273   : > { %v1354_v3 = vpop.permute.xlu0 %1353  ;;  %2612 = vmatprep.mubr.msk.f32.mxu1 %vm899_vm3, %v1503_v2 }
 0x274   : > { %v1487_v24 = vmul.f32 %v1354_v3, %v1295_v60  ;;  %v1439_v5 = vpop.permute.xlu1 %1438 }
 0x275   : > { %v1504_v36 = vmul.f32 %v1439_v5, %v1312_v37 }
 0x276   : > { %2588 = vmatprep.mubr.msk.f32.mxu0 %vm899_vm3, %v1487_v24 }
 0x277   : > { %v1359_v6 = vpop.permute.xlu0 %1358  ;;  %2613 = vmatmul.mubr.msk.f32.gmra.mrb[6].mxu1 %vm899_vm3, %v1504_v36 }
 0x278   : > { %v1488_v63 = vmul.f32 %v1359_v6, %v1296_v4  ;;  %v1444_v9 = vpop.permute.xlu1 %1443 }
 0x279   : > { %v1505_v62 = vmul.f32 %v1444_v9, %v1313_v7 }
 0x27a   : > { %2589 = vmatmul.mubr.msk.f32.gmra.mrb[6].mxu0 %vm899_vm3, %v1488_v63 }
 0x27b   : > { %v1364_v10 = vpop.permute.xlu0 %1363  ;;  %2615 = vmatprep.mubr.msk.f32.mxu1 %vm899_vm3, %v1505_v62 }
 0x27c   : > { %v1489_v13 = vmul.f32 %v1364_v10, %v1297_v8  ;;  %v1449_v18 = vpop.permute.xlu1 %1448 }
 0x27d   : > { %v1506_v54 = vmul.f32 %v1449_v18, %v1314_v15 }
 0x27e   : > { %2591 = vmatprep.mubr.msk.f32.mxu0 %vm899_vm3, %v1489_v13 }
 0x27f   : > { %v1369_v61 = vpop.permute.xlu0 %1368  ;;  %2616 = vmatmul.mubr.msk.f32.gmra.mrb[8].mxu1 %vm899_vm3, %v1506_v54 }
 0x280   : > { %v1490_v19 = vmul.f32 %v1369_v61, %v1298_v17  ;;  %v1454_v25 = vpop.permute.xlu1 %1453 }
 0x281   : > { %v1507_v26 = vmul.f32 %v1454_v25, %v1315_v20 }
 0x282   : > { %2592 = vmatmul.mubr.msk.f32.gmra.mrb[8].mxu0 %vm899_vm3, %v1490_v19 }
 0x283   : > { %v1374_v27 = vpop.permute.xlu0 %1373  ;;  %2618 = vmatprep.mubr.msk.f32.mxu1 %vm899_vm3, %v1507_v26 }
 0x284   : > { %v1491_v22 = vmul.f32 %v1374_v27, %v1299_v23  ;;  %v1459_v30 = vpop.permute.xlu1 %1458 }
 0x285   : > { %v1508_v31 = vmul.f32 %v1459_v30, %v1316_v28 }
 0x286   : > { %2594 = vmatprep.mubr.msk.f32.mxu0 %vm899_vm3, %v1491_v22 }
 0x287   : > { %v1379_v32 = vpop.permute.xlu0 %1378  ;;  %2619 = vmatmul.mubr.msk.f32.gmra.mrb[10].mxu1 %vm899_vm3, %v1508_v31 }
 0x288   : > { %v1492_v33 = vmul.f32 %v1379_v32, %v1300_v29  ;;  %v1464_v42 = vpop.permute.xlu1 %1463 }
 0x289   : > { %v1509_v0 = vmul.f32 %v1464_v42, %v1317_v35 }
 0x28a   : > { %2595 = vmatmul.mubr.msk.f32.gmra.mrb[10].mxu0 %vm899_vm3, %v1492_v33 }
 0x28b   : > { %v1384_v11 = vpop.permute.xlu0 %1383  ;;  %2621 = vmatprep.mubr.msk.f32.mxu1 %vm899_vm3, %v1509_v0 }
 0x28c   : > { %v1493_v43 = vmul.f32 %v1384_v11, %v1301_v38  ;;  %v1469_v44 = vpop.permute.xlu1 %1468 }
 0x28d   : > { %v1510_v45 = vmul.f32 %v1469_v44, %v1318_v34 }
 0x28e   : > { %2597 = vmatprep.mubr.msk.f32.mxu0 %vm899_vm3, %v1493_v43 }
 0x28f   : > { %v1389_v46 = vpop.permute.xlu0 %1388  ;;  %2622 = vmatmul.mubr.msk.f32.gmra.mrb[12].mxu1 %vm899_vm3, %v1510_v45 }
 0x290   : > { %v1494_v47 = vmul.f32 %v1389_v46, %v1302_v40  ;;  %v1474_v50 = vpop.permute.xlu1 %1473 }
 0x291   : > { %v1511_v51 = vmul.f32 %v1474_v50, %v1319_v48 }
 0x292   : > { %2598 = vmatmul.mubr.msk.f32.gmra.mrb[12].mxu0 %vm899_vm3, %v1494_v47 }
 0x293   : > { %v1394_v52 = vpop.permute.xlu0 %1393  ;;  %2624 = vmatprep.mubr.msk.f32.mxu1 %vm899_vm3, %v1511_v51 }
 0x294   : > { %v1495_v16 = vmul.f32 %v1394_v52, %v1303_v49  ;;  %v1479_v12 = vpop.permute.xlu1 %1478 }
 0x295   : > { %v1512_v21 = vmul.f32 %v1479_v12, %v1320_v55 }
 0x296   : > { %2600 = vmatprep.mubr.msk.f32.mxu0 %vm899_vm3, %v1495_v16 }
 0x297   : > { %v1399_v14 = vpop.permute.xlu0 %1398  ;;  %2625 = vmatmul.mubr.msk.f32.gmra.mrb[14].mxu1 %vm899_vm3, %v1512_v21 }
 0x298   : > { %v1496_v57 = vmul.f32 %v1399_v14, %v1304_v56 }
 0x29a   : > { %2601 = vmatmul.mubr.msk.f32.gmra.mrb[14].mxu0 %vm899_vm3, %v1496_v57 }
 0x332   : > { %v2581_v59 = vpop.f32.mrb[0].mxu0 }
 0x333   : > { %v1689_v39 = vadd.f32 %v2581_v59, %v3797_v58  ;;  %v1683_v41 = vpop.f32.mrb[1].mxu0 }
 0x334   : > { %v1684_v53 = vadd.f32 %v3797_v58, %v1683_v41 }
 0x335   : > { %v1843_v60 = vmax.f32 %v1689_v39, 0.0 }
 0x336   : > { %v1842_v1 = vmax.f32 %v1684_v53, 0.0  ;;  %v2605_v2 = vpop.f32.mrb[0].mxu1 }
 0x337   : > { %v1769_v3 = vadd.f32 %v2605_v2, %v3797_v58  ;;  %v1763_v24 = vpop.f32.mrb[1].mxu1 }
 0x338   : > { %v2340_v37 = vpack.c.bf16 %v1843_v60, %v1842_v1  ;;  %v1764_v4 = vadd.f32 %v3797_v58, %v1763_v24 }
 0x339   : > { %v1859_v5 = vmax.f32 %v1769_v3, 0.0 }
 0x33a   : > { %2341 = vst [vmem:[%s3371_s10] sm:$0xff] %v2340_v37   ;;  %v1858_v36 = vmax.f32 %v1764_v4, 0.0  ;;  %v2608_v63 = vpop.f32.mrb[2].mxu1 }
 0x33b   : > { %v1779_v8 = vadd.f32 %v2608_v63, %v3797_v58  ;;  %v1773_v9 = vpop.f32.mrb[3].mxu1 }
 0x33c   : > { %v2380_v6 = vpack.c.bf16 %v1859_v5, %v1858_v36  ;;  %v1774_v13 = vadd.f32 %v3797_v58, %v1773_v9 }
 0x33d   : > { %v2584_v7 = vpop.f32.mrb[2].mxu0  ;;  %v1861_v15 = vmax.f32 %v1779_v8, 0.0 }
 0x33e   : > { %2424 = vst [vmem:[%s3371_s10 + $0x40] sm:$0xff] %v2380_v6   ;;  %v1699_v62 = vadd.f32 %v2584_v7, %v3797_v58  ;;  %v1693_v10 = vpop.f32.mrb[3].mxu0  ;;  %v1860_v54 = vmax.f32 %v1774_v13, 0.0 }
 0x33f   : > { %v1694_v17 = vadd.f32 %v3797_v58, %v1693_v10 }
 0x340   : > { %v1845_v18 = vmax.f32 %v1699_v62, 0.0  ;;  %v2385_v19 = vpack.c.bf16 %v1861_v15, %v1860_v54 }
 0x341   : > { %v1844_v61 = vmax.f32 %v1694_v17, 0.0 }
 0x342   : > { %2425 = vst [vmem:[%s3371_s10 + $0x48] sm:$0xff] %v2385_v19   ;;  %v2611_v23 = vpop.f32.mrb[4].mxu1 }
 0x343   : > { %v2345_v20 = vpack.c.bf16 %v1845_v18, %v1844_v61  ;;  %v1789_v26 = vadd.f32 %v2611_v23, %v3797_v58  ;;  %v1783_v27 = vpop.f32.mrb[5].mxu1 }
 0x344   : > { %v1784_v29 = vadd.f32 %v3797_v58, %v1783_v27 }
 0x345   : > { %2417 = vst [vmem:[%s3371_s10 + $0x8] sm:$0xff] %v2345_v20   ;;  %v2587_v25 = vpop.f32.mrb[4].mxu0  ;;  %v1863_v30 = vmax.f32 %v1789_v26, 0.0 }
 0x346   : > { %v1709_v22 = vadd.f32 %v2587_v25, %v3797_v58  ;;  %v1703_v28 = vpop.f32.mrb[5].mxu0  ;;  %v1862_v33 = vmax.f32 %v1784_v29, 0.0 }
 0x347   : > { %v1704_v31 = vadd.f32 %v3797_v58, %v1703_v28 }
 0x348   : > { %v1847_v32 = vmax.f32 %v1709_v22, 0.0  ;;  %v2390_v38 = vpack.c.bf16 %v1863_v30, %v1862_v33 }
 0x349   : > { %v1846_v35 = vmax.f32 %v1704_v31, 0.0 }
 0x34a   : > { %2426 = vst [vmem:[%s3371_s10 + $0x50] sm:$0xff] %v2390_v38   ;;  %v2614_v0 = vpop.f32.mrb[6].mxu1 }
 0x34b   : > { %v2350_v42 = vpack.c.bf16 %v1847_v32, %v1846_v35  ;;  %v1799_v43 = vadd.f32 %v2614_v0, %v3797_v58  ;;  %v1793_v34 = vpop.f32.mrb[7].mxu1 }
 0x34c   : > { %v1794_v45 = vadd.f32 %v3797_v58, %v1793_v34 }
 0x34d   : > { %2418 = vst [vmem:[%s3371_s10 + $0x10] sm:$0xff] %v2350_v42   ;;  %v2590_v11 = vpop.f32.mrb[6].mxu0  ;;  %v1865_v46 = vmax.f32 %v1799_v43, 0.0 }
 0x34e   : > { %v1719_v40 = vadd.f32 %v2590_v11, %v3797_v58  ;;  %v1713_v44 = vpop.f32.mrb[7].mxu0  ;;  %v1864_v49 = vmax.f32 %v1794_v45, 0.0 }
 0x34f   : > { %v1714_v47 = vadd.f32 %v3797_v58, %v1713_v44 }
 0x350   : > { %v1849_v48 = vmax.f32 %v1719_v40, 0.0  ;;  %v2395_v51 = vpack.c.bf16 %v1865_v46, %v1864_v49 }
 0x351   : > { %v1848_v50 = vmax.f32 %v1714_v47, 0.0 }
 0x352   : > { %2427 = vst [vmem:[%s3371_s10 + $0x58] sm:$0xff] %v2395_v51   ;;  %v2617_v16 = vpop.f32.mrb[8].mxu1 }
 0x353   : > { %v2355_v52 = vpack.c.bf16 %v1849_v48, %v1848_v50  ;;  %v1809_v56 = vadd.f32 %v2617_v16, %v3797_v58  ;;  %v1803_v12 = vpop.f32.mrb[9].mxu1 }
 0x354   : > { %v1804_v57 = vadd.f32 %v3797_v58, %v1803_v12 }
 0x355   : > { %2419 = vst [vmem:[%s3371_s10 + $0x18] sm:$0xff] %v2355_v52   ;;  %v2593_v55 = vpop.f32.mrb[8].mxu0  ;;  %v1867_v59 = vmax.f32 %v1809_v56, 0.0 }
 0x356   : > { %v1729_v21 = vadd.f32 %v2593_v55, %v3797_v58  ;;  %v1723_v14 = vpop.f32.mrb[9].mxu0  ;;  %v1866_v53 = vmax.f32 %v1804_v57, 0.0 }
 0x357   : > { %v1724_v39 = vadd.f32 %v3797_v58, %v1723_v14 }
 0x358   : > { %v1851_v41 = vmax.f32 %v1729_v21, 0.0  ;;  %v2400_v1 = vpack.c.bf16 %v1867_v59, %v1866_v53 }
 0x359   : > { %v1850_v60 = vmax.f32 %v1724_v39, 0.0 }
 0x35a   : > { %2428 = vst [vmem:[%s3371_s10 + $0x60] sm:$0xff] %v2400_v1   ;;  %v2620_v3 = vpop.f32.mrb[10].mxu1 }
 0x35b   : > { %v2360_v2 = vpack.c.bf16 %v1851_v41, %v1850_v60  ;;  %v1819_v37 = vadd.f32 %v2620_v3, %v3797_v58  ;;  %v1813_v4 = vpop.f32.mrb[11].mxu1 }
 0x35c   : > { %v1814_v6 = vadd.f32 %v3797_v58, %v1813_v4 }
 0x35d   : > { %2420 = vst [vmem:[%s3371_s10 + $0x20] sm:$0xff] %v2360_v2   ;;  %v2596_v24 = vpop.f32.mrb[10].mxu0  ;;  %v1869_v63 = vmax.f32 %v1819_v37, 0.0 }
 0x35e   : > { %v1739_v5 = vadd.f32 %v2596_v24, %v3797_v58  ;;  %v1733_v36 = vpop.f32.mrb[11].mxu0  ;;  %v1868_v9 = vmax.f32 %v1814_v6, 0.0 }
 0x35f   : > { %v1734_v7 = vadd.f32 %v3797_v58, %v1733_v36 }
 0x360   : > { %v1853_v8 = vmax.f32 %v1739_v5, 0.0  ;;  %v2405_v10 = vpack.c.bf16 %v1869_v63, %v1868_v9 }
 0x361   : > { %v1852_v62 = vmax.f32 %v1734_v7, 0.0 }
 0x362   : > { %2429 = vst [vmem:[%s3371_s10 + $0x68] sm:$0xff] %v2405_v10   ;;  %v2623_v15 = vpop.f32.mrb[12].mxu1 }
 0x363   : > { %v2365_v13 = vpack.c.bf16 %v1853_v8, %v1852_v62  ;;  %v1829_v18 = vadd.f32 %v2623_v15, %v3797_v58  ;;  %v1823_v54 = vpop.f32.mrb[13].mxu1 }
 0x364   : > { %v1824_v20 = vadd.f32 %v3797_v58, %v1823_v54 }
 0x365   : > { %2421 = vst [vmem:[%s3371_s10 + $0x28] sm:$0xff] %v2365_v13   ;;  %v2599_v17 = vpop.f32.mrb[12].mxu0  ;;  %v1871_v23 = vmax.f32 %v1829_v18, 0.0 }
 0x366   : > { %v1749_v61 = vadd.f32 %v2599_v17, %v3797_v58  ;;  %v1743_v19 = vpop.f32.mrb[13].mxu0  ;;  %v1870_v27 = vmax.f32 %v1824_v20, 0.0 }
 0x367   : > { %v1744_v25 = vadd.f32 %v3797_v58, %v1743_v19 }
 0x368   : > { %v1855_v26 = vmax.f32 %v1749_v61, 0.0  ;;  %v2410_v28 = vpack.c.bf16 %v1871_v23, %v1870_v27 }
 0x369   : > { %v1854_v22 = vmax.f32 %v1744_v25, 0.0 }
 0x36a   : > { %2430 = vst [vmem:[%s3371_s10 + $0x70] sm:$0xff] %v2410_v28   ;;  %v2626_v30 = vpop.f32.mrb[14].mxu1 }
 0x36b   : > { %v2370_v29 = vpack.c.bf16 %v1855_v26, %v1854_v22  ;;  %v1839_v32 = vadd.f32 %v2626_v30, %v3797_v58  ;;  %v1833_v33 = vpop.f32.mrb[15].mxu1 }
 0x36c   : > { %v1834_v42 = vadd.f32 %v3797_v58, %v1833_v33 }
 0x36d   : > { %2422 = vst [vmem:[%s3371_s10 + $0x30] sm:$0xff] %v2370_v29   ;;  %v2602_v31 = vpop.f32.mrb[14].mxu0  ;;  %v1873_v0 = vmax.f32 %v1839_v32, 0.0 }
 0x36e   : > { %v1759_v35 = vadd.f32 %v2602_v31, %v3797_v58  ;;  %v1753_v38 = vpop.f32.mrb[15].mxu0  ;;  %v1872_v34 = vmax.f32 %v1834_v42, 0.0 }
 0x36f   : > { %v1754_v11 = vadd.f32 %v3797_v58, %v1753_v38 }
 0x370   : > { %v1857_v43 = vmax.f32 %v1759_v35, 0.0  ;;  %v2415_v44 = vpack.c.bf16 %v1873_v0, %v1872_v34 }
 0x371   : > { %v1856_v40 = vmax.f32 %v1754_v11, 0.0 }
 0x372   : > { %2431 = vst [vmem:[%s3371_s10 + $0x78] sm:$0xff] %v2415_v44  }
 0x373   : > { %v2375_v45 = vpack.c.bf16 %v1857_v43, %v1856_v40 }
 0x375   : > { %2423 = vst [vmem:[%s3371_s10 + $0x38] sm:$0xff] %v2375_v45  }
 0x376 PF: > { %s2336_s21 = sshll.u32 %s3090_s22, 11  ;;  %s2048_s2 = sshll.u32 %s3371_s10, 4  ;;  %s3854_s2 = int_to_ptr.vmem [resolvable:$true] %s2048_s2 }
 0x377   : > { %s3851_s12 = scalar_lea.hbm %s3923_s4, %s2336_s21  ;;  %s3858_s3 = scalar_lea.sflag [#allocation6], %s271_s9 }
 0x378   : > { %s2976_s25 = scalar_lea.vmem %s3854_s2, 2048  ;;  %p3959_p12 = scmp.ne.s32.totalorder %s3943_s7, 0 }
 0x379   : > { %p2977_p9 = scmp.ne.s32.totalorder %s3854_s2, %s2976_s25  ;;  %s3112_s22 = smov [#allocation10]  }
 0x37a   : > { %s2980_s28 = sshll.u32 %s3112_s22, 4  ;;  %s2981_s28 = int_to_ptr.vmem [resolvable:$false] %s2980_s28 }
 0x37b   : > { %p2978_p5 = pnand %p2977_p9, %p3959_p12  ;;  %s2982_s30 = scalar_lea.vmem %s2981_s28, 4096 }
 0x37c   : > { %p2983_p6 = scmp.lt.s32.totalorder %s3854_s2, %s2981_s28  ;;  %p2984_p7 = scmp.lt.s32.totalorder %s2982_s30, %s2976_s25 }
 0x37d   : > { %p2979_p3 = pneg %p2978_p5 }
 0x37e   : > { %p2985_p11 = por %p2984_p7, %p2983_p6 }
 0x380   : > { %p2986_p13 = pnand %p2985_p11, %p2979_p3 }
 0x382   : > { %2989 = shalt.err (!%p2986_p13)
}
 0x383   : > { %s2990_s27 = scalar_lea.hbm %s3851_s12, 2048  ;;  %s2994_s8 = scalar_lea.hbm %s3923_s4, 6144 }
 0x384   : > { %p2991_p0 = scmp.ne.s32.totalorder %s3851_s12, %s2990_s27  ;;  %p2995_p10 = scmp.lt.u32.totalorder %s3851_s12, %s3923_s4 }
 0x385   : > { %p2996_p1 = scmp.lt.u32.totalorder %s2994_s8, %s2990_s27  ;;  %p2998_p9 = scmp.lt.u32.totalorder %s2990_s27, %s3851_s12 }
 0x386   : > { %p2992_p8 = pnand %p2991_p0, %p3959_p12 }
 0x387   : > { %p2997_p2 = por %p2996_p1, %p2995_p10 }
 0x388   : > { %p2993_p4 = pneg %p2992_p8 }
 0x389   : > { %p2999_p5 = por %p2998_p9, %p2997_p2 }
 0x38b   : > { %p3000_p3 = pnand %p2999_p5, %p2993_p4 }
 0x38d   : > { %3003 = shalt.err (!%p3000_p3)
}
 0x38e   : > { %s3113_s15 = smov 64   ;;  %s3114_s6 = smov 4  }
 0x38f   : > { %2656 = dma.vmem_to_hbm [thread:$0]  (%p3959_p12), %s3854_s2, 2048, %s3851_s12, %s3858_s3, %s3113_s15, %s3113_s15, %s3114_s6  }
 0x390 PF: > { %s3960_s10 = sld [smem:[#allocation15_spill]]  ;;  %s3961_s21 = sld [smem:[#allocation14_spill]] }
 0x391   : > { %s3962_s29 = sld [smem:[#allocation16_spill]] }
 0x396   : > { %p2678_p6 = scmp.ge.s32.totalorder %s3960_s10, 2  ;;  %s2063_s5 = sand.u32 1, %s3961_s21  }
 0x397   : > { %p3963_p7 = scmp.ne.s32.totalorder %s3962_s29, 0  ;;  %s2064_s25 = scalar_lea.sflag [#allocation6], %s2063_s5 }
 0x399   : > { %p2670_p11 = pnand %p2678_p6, %p3963_p7 }
 0x39b   : > { %3057 = dma.done.wait (!%p2670_p11), %s2064_s25, 2048  }
 0x39c   : > { %3059 = vsyncadd (!%p2670_p11), %s2064_s25, 4294965248  ;;  %s21_s25 = sadd.s32 1, %s3960_s10   ;;  %s3964_s7 = sld [smem:[#allocation17_spill]] }
 0x39d   : > { %p18_p13 = scmp.ge.s32.totalorder %s21_s25, 11   ;;  %s3965_s12 = sld [smem:[#allocation18_spill]] }
 0x39e   : > { %s3966_s15 = smov %s3066_s16  ;;  %s3967_s16 = smov %s3070_s17 }
 0x39f   : > { %s3968_s17 = smov %s3314_s11  ;;  %s3969_s18 = smov %s3078_s19 }
 0x3a0   : > { %s3970_s19 = smov %s3082_s20  ;;  %s3971_s20 = smov %s3319_s14 }
 0x3a1   : > { %s3972_s21 = smov %s3094_s23  ;;  %s3973_s22 = smov %s3098_s24 }
 0x3a2   : > { %s3974_s23 = smov %s3964_s7  ;;  %20 = sbr.rel (!%p18_p13) target bundleno = 13 (0xd), region = 100 }
 0x3a3   : > { %s3975_s24 = smov %s3965_s12 }
 0x3a9   :  { %2069 = vsyncpa [#allocation5], 1 }
 0x3aa   :  { %2071 = vsyncpa [#allocation5 + $0x1], 1 }
 0x3ab   :  { %2072 = vsyncpa [#allocation8], 1 }
 0x3ac   :  { %2073 = vsyncpa [#allocation6], 1 }
 0x3ad   :  { %2075 = vsyncpa [#allocation6 + $0x1], 1 }

</bundles_post_ra>
